<compile_context>
chip_gen: v5e
topology: v5e:2x2
jax: 0.10.0
libtpu: 0.0.40
codegen_flags: <defaults>
</compile_context>

<pallas_src>
import numpy as np
import jax
import jax.numpy as jnp
from jax.experimental import pallas as pl
from jax.experimental.pallas import tpu as pltpu


# ---------------------------------------------------------------------------
# The single fused kernel (runs once per image; grid=(B,))
# ---------------------------------------------------------------------------
def _net_kernel(x_ref, bev_ref, bod_ref, sel1_ref, b1t_ref,
                dev_ref, dod_ref, sel2_ref, b2t_ref,
                fw1_ref, fb1_ref, fw2_ref, fb2_ref, out_ref):
    f32 = jnp.float32
    x = x_ref[0]                                               # (28, 28)

    # ---- conv1 (1->10, k=5) + 2x2 max-pool + ReLU, all in VMEM ----------
    # acat[ho, i*28 + w] = x[ho + i, w]
    acat = jnp.concatenate([x[i:i + 24, :] for i in range(5)], axis=1)   # (24, 140)
    c1e = jnp.dot(acat, bev_ref[...], preferred_element_type=f32)        # even cols (24, 120)
    c1o = jnp.dot(acat, bod_ref[...], preferred_element_type=f32)        # odd  cols (24, 120)
    wmax1 = jnp.maximum(c1e, c1o)                                        # W-direction pool
    rsel1 = jnp.dot(sel1_ref[...], wmax1, preferred_element_type=f32)    # rows: [even rows; odd rows]
    pooled1 = jnp.maximum(rsel1[0:12, :], rsel1[12:24, :])               # H-direction pool (12, 120)
    a1 = jnp.maximum(pooled1 + b1t_ref[...], 0.0)                        # [hp, wp*10 + ci]

    # ---- conv2 (10->20, k=5) + 2x2 max-pool + ReLU -----------------------
    rcat = jnp.concatenate([a1[i:i + 8, :] for i in range(5)], axis=1)   # (8, 600)
    c2e = jnp.dot(rcat, dev_ref[...], preferred_element_type=f32)        # (8, 80)
    c2o = jnp.dot(rcat, dod_ref[...], preferred_element_type=f32)        # (8, 80)
    wmax2 = jnp.maximum(c2e, c2o)
    rsel2 = jnp.dot(sel2_ref[...], wmax2, preferred_element_type=f32)    # (8, 80)
    pooled2 = jnp.maximum(rsel2[0:4, :], rsel2[4:8, :])                  # (4, 80)
    a2 = jnp.maximum(pooled2 + b2t_ref[...], 0.0)                        # [hp, wp*20 + co]

    # ---- flatten (.view(-1, 320); fc1 weights are pre-permuted to match) --
    flat = jnp.concatenate([a2[h:h + 1, :] for h in range(4)], axis=1)   # (1, 320)
    h1 = jnp.dot(flat, fw1_ref[...], preferred_element_type=f32) + fb1_ref[...]
    h1 = jnp.maximum(h1, 0.0)                                            # (1, 50)

    # ---- fc2 (N padded to 128 lanes) + fused log_softmax ------------------
    # Padded weight columns are zero and padded bias columns are -1e30, so
    # the padded logits never affect the row max / sum.
    logits = jnp.dot(h1, fw2_ref[...], preferred_element_type=f32) + fb2_ref[...]  # (1, 128)
    m = jnp.max(logits, axis=-1, keepdims=True)
    sh = logits - m
    lse = jnp.log(jnp.sum(jnp.exp(sh), axis=-1, keepdims=True))
    out_ref[0] = (sh - lse).astype(out_ref.dtype)


# ---------------------------------------------------------------------------
# Host-side weight packing (done once; pure numpy)
# ---------------------------------------------------------------------------
def pack_params(params):
    w1, b1, w2, b2, fw1, fb1, fw2, fb2 = [np.asarray(p, np.float32) for p in params]

    # conv1 -> (24,140) @ (140,120); output layout [ho, wp*10 + co]
    bev = np.zeros((5 * 28, 12 * 10), np.float32)
    bod = np.zeros((5 * 28, 12 * 10), np.float32)
    for i in range(5):
        for j in range(5):
            for wp in range(12):
                bev[i * 28 + 2 * wp + j, wp * 10:(wp + 1) * 10] += w1[:, 0, i, j]
                bod[i * 28 + 2 * wp + 1 + j, wp * 10:(wp + 1) * 10] += w1[:, 0, i, j]

    # conv2 -> (8,600) @ (600,80); output layout [ho2, wp2*20 + co]
    dev = np.zeros((5 * 120, 4 * 20), np.float32)
    dod = np.zeros((5 * 120, 4 * 20), np.float32)
    for i in range(5):
        for j in range(5):
            for wp in range(4):
                we, wo = 2 * wp + j, 2 * wp + 1 + j
                dev[i * 120 + we * 10:i * 120 + we * 10 + 10, wp * 20:(wp + 1) * 20] += w2[:, :, i, j].T
                dod[i * 120 + wo * 10:i * 120 + wo * 10 + 10, wp * 20:(wp + 1) * 20] += w2[:, :, i, j].T

    # H-pool row-selection matrices: rows 0..n/2-1 pick even conv rows, rest pick odd rows.
    sel1 = np.zeros((24, 24), np.float32)
    for hp in range(12):
        sel1[hp, 2 * hp] = 1.0
        sel1[12 + hp, 2 * hp + 1] = 1.0
    sel2 = np.zeros((8, 8), np.float32)
    for hp in range(4):
        sel2[hp, 2 * hp] = 1.0
        sel2[4 + hp, 2 * hp + 1] = 1.0

    # Per-channel biases tiled to the [w*C + c] lane layout.
    b1t = np.tile(b1, 12).reshape(1, 120)
    b2t = np.tile(b2, 4).reshape(1, 80)

    # fc1 weights permuted so the kernel's [h, w*20 + c] flatten order matches
    # torch's .view(-1, 320) order [c*16 + h*4 + w].
    fw1p = fw1.reshape(50, 20, 4, 4).transpose(2, 3, 1, 0).reshape(320, 50)
    fb1r = fb1.reshape(1, 50)

    # fc2 padded to 128 lanes; padded bias = -1e30 so log_softmax ignores pads.
    fw2p = np.zeros((50, 128), np.float32)
    fw2p[:, :10] = fw2.T
    fb2p = np.full((1, 128), -1e30, np.float32)
    fb2p[0, :10] = fb2

    return tuple(jnp.asarray(a) for a in
                 (bev, bod, sel1, b1t, dev, dod, sel2, b2t, fw1p, fb1r, fw2p, fb2p))


# ---------------------------------------------------------------------------
# Forward pass wrapper (single pallas_call)
# ---------------------------------------------------------------------------
@jax.jit
def net_forward(x, packed):
    B = x.shape[0]
    x3d = x.reshape(B, 28, 28).astype(jnp.float32)
    out = pl.pallas_call(
        _net_kernel,
        out_shape=jax.ShapeDtypeStruct((B, 1, 128), jnp.float32),
        grid=(B,),
        in_specs=[
            pl.BlockSpec((1, 28, 28), lambda b: (b, 0, 0)),   # image
            pl.BlockSpec((140, 120), lambda b: (0, 0)),       # conv1 even-col weights
            pl.BlockSpec((140, 120), lambda b: (0, 0)),       # conv1 odd-col  weights
            pl.BlockSpec((24, 24), lambda b: (0, 0)),         # conv1 row-pool select
            pl.BlockSpec((1, 120), lambda b: (0, 0)),         # conv1 bias (tiled)
            pl.BlockSpec((600, 80), lambda b: (0, 0)),        # conv2 even-col weights
            pl.BlockSpec((600, 80), lambda b: (0, 0)),        # conv2 odd-col  weights
            pl.BlockSpec((8, 8), lambda b: (0, 0)),           # conv2 row-pool select
            pl.BlockSpec((1, 80), lambda b: (0, 0)),          # conv2 bias (tiled)
            pl.BlockSpec((320, 50), lambda b: (0, 0)),        # fc1 weights (permuted)
            pl.BlockSpec((1, 50), lambda b: (0, 0)),          # fc1 bias
            pl.BlockSpec((50, 128), lambda b: (0, 0)),        # fc2 weights (128-padded)
            pl.BlockSpec((1, 128), lambda b: (0, 0)),         # fc2 bias   (128-padded)
        ],
        out_specs=pl.BlockSpec((1, 1, 128), lambda b: (b, 0, 0)),
        compiler_params=pltpu.CompilerParams(
            dimension_semantics=("parallel",)),
    )(x3d, *packed)
    return out[:, 0, :10]


# ---------------------------------------------------------------------------
# Pure-JAX reference for the correctness check
# ---------------------------------------------------------------------------
def ref_forward(x, params):
    w1, b1, w2, b2, fw1, fb1, fw2, fb2 = params
    dn = ("NCHW", "OIHW", "NCHW")
    c1 = jax.lax.conv_general_dilated(x, w1, (1, 1), "VALID",
                                      dimension_numbers=dn) + b1[None, :, None, None]
    a1 = jnp.maximum(jax.lax.reduce_window(c1, -jnp.inf, jax.lax.max,
                                           (1, 1, 2, 2), (1, 1, 2, 2), "VALID"), 0.0)
    c2 = jax.lax.conv_general_dilated(a1, w2, (1, 1), "VALID",
                                      dimension_numbers=dn) + b2[None, :, None, None]
    a2 = jnp.maximum(jax.lax.reduce_window(c2, -jnp.inf, jax.lax.max,
                                           (1, 1, 2, 2), (1, 1, 2, 2), "VALID"), 0.0)
    flat = a2.reshape(x.shape[0], 320)
    h = jnp.maximum(flat @ fw1.T + fb1, 0.0)
    o = h @ fw2.T + fb2
    return jax.nn.log_softmax(o, axis=-1)


if __name__ == "__main__":
    key = jax.random.PRNGKey(0)
    ks = jax.random.split(key, 9)
    # Deterministic synthetic parameters (same shapes as the PyTorch module)
    w1 = jax.random.normal(ks[0], (10, 1, 5, 5), jnp.float32) * 0.1
    b1 = jax.random.normal(ks[1], (10,), jnp.float32) * 0.1
    w2 = jax.random.normal(ks[2], (20, 10, 5, 5), jnp.float32) * 0.1
    b2 = jax.random.normal(ks[3], (20,), jnp.float32) * 0.1
    fw1 = jax.random.normal(ks[4], (50, 320), jnp.float32) * 0.05
    fb1 = jax.random.normal(ks[5], (50,), jnp.float32) * 0.05
    fw2 = jax.random.normal(ks[6], (10, 50), jnp.float32) * 0.05
    fb2 = jax.random.normal(ks[7], (10,), jnp.float32) * 0.05
    params = (w1, b1, w2, b2, fw1, fb1, fw2, fb2)

    # MNIST-style input: batch=2, 1 channel, 28x28 (required for the 320 flatten)
    x = jax.random.normal(ks[8], (2, 1, 28, 28), jnp.float32)

    packed = pack_params(params)
    out = jax.block_until_ready(net_forward(x, packed))
    ref = jax.block_until_ready(ref_forward(x, params))

    assert out.shape == (2, 10)
    assert np.allclose(np.asarray(out), np.asarray(ref), rtol=1e-4, atol=1e-4)
    print("KERNEL_OK")
</pallas_src>

<mosaic_0001>
module attributes {stable_mosaic.version = 11 : i64} {
  func.func @_net_kernel(%arg0: i32, %arg1: memref<1x28x28xf32, #tpu.memory_space<vmem>>, %arg2: memref<140x120xf32, #tpu.memory_space<vmem>>, %arg3: memref<140x120xf32, #tpu.memory_space<vmem>>, %arg4: memref<24x24xf32, #tpu.memory_space<vmem>>, %arg5: memref<1x120xf32, #tpu.memory_space<vmem>>, %arg6: memref<600x80xf32, #tpu.memory_space<vmem>>, %arg7: memref<600x80xf32, #tpu.memory_space<vmem>>, %arg8: memref<8x8xf32, #tpu.memory_space<vmem>>, %arg9: memref<1x80xf32, #tpu.memory_space<vmem>>, %arg10: memref<320x50xf32, #tpu.memory_space<vmem>>, %arg11: memref<1x50xf32, #tpu.memory_space<vmem>>, %arg12: memref<50x128xf32, #tpu.memory_space<vmem>>, %arg13: memref<1x128xf32, #tpu.memory_space<vmem>>, %arg14: memref<1x1x128xf32, #tpu.memory_space<vmem>>) attributes {dimension_semantics = [#tpu.dimension_semantics<parallel>], iteration_bounds = array<i64: 2>, scalar_prefetch = 0 : i64, scratch_operands = 0 : i64, tpu.core_type = #tpu.core_type<tc>, window_params = [{transform_indices = @transform_0, window_bounds = array<i64: 1, 28, 28>}, {pipeline_mode = #tpu.pipeline_mode<synchronous>, transform_indices = @transform_1, window_bounds = array<i64: 140, 120>}, {pipeline_mode = #tpu.pipeline_mode<synchronous>, transform_indices = @transform_2, window_bounds = array<i64: 140, 120>}, {pipeline_mode = #tpu.pipeline_mode<synchronous>, transform_indices = @transform_3, window_bounds = array<i64: 24, 24>}, {pipeline_mode = #tpu.pipeline_mode<synchronous>, transform_indices = @transform_4, window_bounds = array<i64: 1, 120>}, {pipeline_mode = #tpu.pipeline_mode<synchronous>, transform_indices = @transform_5, window_bounds = array<i64: 600, 80>}, {pipeline_mode = #tpu.pipeline_mode<synchronous>, transform_indices = @transform_6, window_bounds = array<i64: 600, 80>}, {pipeline_mode = #tpu.pipeline_mode<synchronous>, transform_indices = @transform_7, window_bounds = array<i64: 8, 8>}, {pipeline_mode = #tpu.pipeline_mode<synchronous>, transform_indices = @transform_8, window_bounds = array<i64: 1, 80>}, {pipeline_mode = #tpu.pipeline_mode<synchronous>, transform_indices = @transform_9, window_bounds = array<i64: 320, 50>}, {pipeline_mode = #tpu.pipeline_mode<synchronous>, transform_indices = @transform_10, window_bounds = array<i64: 1, 50>}, {pipeline_mode = #tpu.pipeline_mode<synchronous>, transform_indices = @transform_11, window_bounds = array<i64: 50, 128>}, {pipeline_mode = #tpu.pipeline_mode<synchronous>, transform_indices = @transform_12, window_bounds = array<i64: 1, 128>}, {transform_indices = @transform_13, window_bounds = array<i64: 1, 1, 128>}]} {
    %c0 = arith.constant 0 : index
    %c0_0 = arith.constant 0 : index
    %c0_1 = arith.constant 0 : index
    %0 = vector.load %arg1[%c0, %c0_0, %c0_1] : memref<1x28x28xf32, #tpu.memory_space<vmem>>, vector<1x28x28xf32>
    %1 = vector.shape_cast %0 : vector<1x28x28xf32> to vector<28x28xf32>
    %2 = vector.extract_strided_slice %1 {offsets = [0, 0], sizes = [24, 28], strides = [1, 1]} : vector<28x28xf32> to vector<24x28xf32>
    %3 = vector.extract_strided_slice %1 {offsets = [1, 0], sizes = [24, 28], strides = [1, 1]} : vector<28x28xf32> to vector<24x28xf32>
    %4 = vector.extract_strided_slice %1 {offsets = [2, 0], sizes = [24, 28], strides = [1, 1]} : vector<28x28xf32> to vector<24x28xf32>
    %5 = vector.extract_strided_slice %1 {offsets = [3, 0], sizes = [24, 28], strides = [1, 1]} : vector<28x28xf32> to vector<24x28xf32>
    %6 = vector.extract_strided_slice %1 {offsets = [4, 0], sizes = [24, 28], strides = [1, 1]} : vector<28x28xf32> to vector<24x28xf32>
    %7 = tpu.concatenate %2, %3, %4, %5, %6 in 1 : vector<24x28xf32>, vector<24x28xf32>, vector<24x28xf32>, vector<24x28xf32>, vector<24x28xf32> -> vector<24x140xf32>
    %c0_2 = arith.constant 0 : index
    %c0_3 = arith.constant 0 : index
    %8 = vector.load %arg2[%c0_2, %c0_3] : memref<140x120xf32, #tpu.memory_space<vmem>>, vector<140x120xf32>
    %cst = arith.constant dense<0.000000e+00> : vector<24x120xf32>
    %9 = tpu.matmul %7, %8, %cst {dimension_numbers = #tpu.dot_dimension_numbers<[1], [0], [0], [1], [0, 0, 1, 1], [], []>} : vector<24x140xf32>, vector<140x120xf32>, vector<24x120xf32> -> vector<24x120xf32>
    %c0_4 = arith.constant 0 : index
    %c0_5 = arith.constant 0 : index
    %10 = vector.load %arg3[%c0_4, %c0_5] : memref<140x120xf32, #tpu.memory_space<vmem>>, vector<140x120xf32>
    %cst_6 = arith.constant dense<0.000000e+00> : vector<24x120xf32>
    %11 = tpu.matmul %7, %10, %cst_6 {dimension_numbers = #tpu.dot_dimension_numbers<[1], [0], [0], [1], [0, 0, 1, 1], [], []>} : vector<24x140xf32>, vector<140x120xf32>, vector<24x120xf32> -> vector<24x120xf32>
    %12 = arith.maximumf %9, %11 : vector<24x120xf32>
    %c0_7 = arith.constant 0 : index
    %c0_8 = arith.constant 0 : index
    %13 = vector.load %arg4[%c0_7, %c0_8] : memref<24x24xf32, #tpu.memory_space<vmem>>, vector<24x24xf32>
    %cst_9 = arith.constant dense<0.000000e+00> : vector<24x120xf32>
    %14 = tpu.matmul %13, %12, %cst_9 {dimension_numbers = #tpu.dot_dimension_numbers<[1], [0], [0], [1], [0, 0, 1, 1], [], []>} : vector<24x24xf32>, vector<24x120xf32>, vector<24x120xf32> -> vector<24x120xf32>
    %15 = vector.extract_strided_slice %14 {offsets = [0, 0], sizes = [12, 120], strides = [1, 1]} : vector<24x120xf32> to vector<12x120xf32>
    %16 = vector.extract_strided_slice %14 {offsets = [12, 0], sizes = [12, 120], strides = [1, 1]} : vector<24x120xf32> to vector<12x120xf32>
    %17 = arith.maximumf %15, %16 : vector<12x120xf32>
    %c0_10 = arith.constant 0 : index
    %c0_11 = arith.constant 0 : index
    %18 = vector.load %arg5[%c0_10, %c0_11] : memref<1x120xf32, #tpu.memory_space<vmem>>, vector<1x120xf32>
    %19 = vector.broadcast %18 : vector<1x120xf32> to vector<12x120xf32>
    %20 = arith.addf %17, %19 : vector<12x120xf32>
    %cst_12 = arith.constant 0.000000e+00 : f32
    %21 = vector.broadcast %cst_12 : f32 to vector<12x120xf32>
    %22 = arith.maximumf %20, %21 : vector<12x120xf32>
    %23 = vector.extract_strided_slice %22 {offsets = [0, 0], sizes = [8, 120], strides = [1, 1]} : vector<12x120xf32> to vector<8x120xf32>
    %24 = vector.extract_strided_slice %22 {offsets = [1, 0], sizes = [8, 120], strides = [1, 1]} : vector<12x120xf32> to vector<8x120xf32>
    %25 = vector.extract_strided_slice %22 {offsets = [2, 0], sizes = [8, 120], strides = [1, 1]} : vector<12x120xf32> to vector<8x120xf32>
    %26 = vector.extract_strided_slice %22 {offsets = [3, 0], sizes = [8, 120], strides = [1, 1]} : vector<12x120xf32> to vector<8x120xf32>
    %27 = vector.extract_strided_slice %22 {offsets = [4, 0], sizes = [8, 120], strides = [1, 1]} : vector<12x120xf32> to vector<8x120xf32>
    %28 = tpu.concatenate %23, %24, %25, %26, %27 in 1 : vector<8x120xf32>, vector<8x120xf32>, vector<8x120xf32>, vector<8x120xf32>, vector<8x120xf32> -> vector<8x600xf32>
    %c0_13 = arith.constant 0 : index
    %c0_14 = arith.constant 0 : index
    %29 = vector.load %arg6[%c0_13, %c0_14] : memref<600x80xf32, #tpu.memory_space<vmem>>, vector<600x80xf32>
    %cst_15 = arith.constant dense<0.000000e+00> : vector<8x80xf32>
    %30 = tpu.matmul %28, %29, %cst_15 {dimension_numbers = #tpu.dot_dimension_numbers<[1], [0], [0], [1], [0, 0, 1, 1], [], []>} : vector<8x600xf32>, vector<600x80xf32>, vector<8x80xf32> -> vector<8x80xf32>
    %c0_16 = arith.constant 0 : index
    %c0_17 = arith.constant 0 : index
    %31 = vector.load %arg7[%c0_16, %c0_17] : memref<600x80xf32, #tpu.memory_space<vmem>>, vector<600x80xf32>
    %cst_18 = arith.constant dense<0.000000e+00> : vector<8x80xf32>
    %32 = tpu.matmul %28, %31, %cst_18 {dimension_numbers = #tpu.dot_dimension_numbers<[1], [0], [0], [1], [0, 0, 1, 1], [], []>} : vector<8x600xf32>, vector<600x80xf32>, vector<8x80xf32> -> vector<8x80xf32>
    %33 = arith.maximumf %30, %32 : vector<8x80xf32>
    %c0_19 = arith.constant 0 : index
    %c0_20 = arith.constant 0 : index
    %34 = vector.load %arg8[%c0_19, %c0_20] : memref<8x8xf32, #tpu.memory_space<vmem>>, vector<8x8xf32>
    %cst_21 = arith.constant dense<0.000000e+00> : vector<8x80xf32>
    %35 = tpu.matmul %34, %33, %cst_21 {dimension_numbers = #tpu.dot_dimension_numbers<[1], [0], [0], [1], [0, 0, 1, 1], [], []>} : vector<8x8xf32>, vector<8x80xf32>, vector<8x80xf32> -> vector<8x80xf32>
    %36 = vector.extract_strided_slice %35 {offsets = [0, 0], sizes = [4, 80], strides = [1, 1]} : vector<8x80xf32> to vector<4x80xf32>
    %37 = vector.extract_strided_slice %35 {offsets = [4, 0], sizes = [4, 80], strides = [1, 1]} : vector<8x80xf32> to vector<4x80xf32>
    %38 = arith.maximumf %36, %37 : vector<4x80xf32>
    %c0_22 = arith.constant 0 : index
    %c0_23 = arith.constant 0 : index
    %39 = vector.load %arg9[%c0_22, %c0_23] : memref<1x80xf32, #tpu.memory_space<vmem>>, vector<1x80xf32>
    %40 = vector.broadcast %39 : vector<1x80xf32> to vector<4x80xf32>
    %41 = arith.addf %38, %40 : vector<4x80xf32>
    %cst_24 = arith.constant 0.000000e+00 : f32
    %42 = vector.broadcast %cst_24 : f32 to vector<4x80xf32>
    %43 = arith.maximumf %41, %42 : vector<4x80xf32>
    %44 = vector.extract_strided_slice %43 {offsets = [0, 0], sizes = [1, 80], strides = [1, 1]} : vector<4x80xf32> to vector<1x80xf32>
    %45 = vector.extract_strided_slice %43 {offsets = [1, 0], sizes = [1, 80], strides = [1, 1]} : vector<4x80xf32> to vector<1x80xf32>
    %46 = vector.extract_strided_slice %43 {offsets = [2, 0], sizes = [1, 80], strides = [1, 1]} : vector<4x80xf32> to vector<1x80xf32>
    %47 = vector.extract_strided_slice %43 {offsets = [3, 0], sizes = [1, 80], strides = [1, 1]} : vector<4x80xf32> to vector<1x80xf32>
    %48 = tpu.concatenate %44, %45, %46, %47 in 1 : vector<1x80xf32>, vector<1x80xf32>, vector<1x80xf32>, vector<1x80xf32> -> vector<1x320xf32>
    %c0_25 = arith.constant 0 : index
    %c0_26 = arith.constant 0 : index
    %49 = vector.load %arg10[%c0_25, %c0_26] : memref<320x50xf32, #tpu.memory_space<vmem>>, vector<320x50xf32>
    %cst_27 = arith.constant dense<0.000000e+00> : vector<1x50xf32>
    %50 = tpu.matmul %48, %49, %cst_27 {dimension_numbers = #tpu.dot_dimension_numbers<[1], [0], [0], [1], [0, 0, 1, 1], [], []>} : vector<1x320xf32>, vector<320x50xf32>, vector<1x50xf32> -> vector<1x50xf32>
    %c0_28 = arith.constant 0 : index
    %c0_29 = arith.constant 0 : index
    %51 = vector.load %arg11[%c0_28, %c0_29] : memref<1x50xf32, #tpu.memory_space<vmem>>, vector<1x50xf32>
    %52 = arith.addf %50, %51 : vector<1x50xf32>
    %cst_30 = arith.constant 0.000000e+00 : f32
    %53 = vector.broadcast %cst_30 : f32 to vector<1x50xf32>
    %54 = arith.maximumf %52, %53 : vector<1x50xf32>
    %c0_31 = arith.constant 0 : index
    %c0_32 = arith.constant 0 : index
    %55 = vector.load %arg12[%c0_31, %c0_32] : memref<50x128xf32, #tpu.memory_space<vmem>>, vector<50x128xf32>
    %cst_33 = arith.constant dense<0.000000e+00> : vector<1x128xf32>
    %56 = tpu.matmul %54, %55, %cst_33 {dimension_numbers = #tpu.dot_dimension_numbers<[1], [0], [0], [1], [0, 0, 1, 1], [], []>} : vector<1x50xf32>, vector<50x128xf32>, vector<1x128xf32> -> vector<1x128xf32>
    %c0_34 = arith.constant 0 : index
    %c0_35 = arith.constant 0 : index
    %57 = vector.load %arg13[%c0_34, %c0_35] : memref<1x128xf32, #tpu.memory_space<vmem>>, vector<1x128xf32>
    %58 = arith.addf %56, %57 : vector<1x128xf32>
    %cst_36 = arith.constant dense<0xFF800000> : vector<1xf32>
    %59 = vector.multi_reduction <maximumf>, %58, %cst_36 [1] : vector<1x128xf32> to vector<1xf32>
    %60 = vector.shape_cast %59 : vector<1xf32> to vector<1x1xf32>
    %61 = vector.broadcast %60 : vector<1x1xf32> to vector<1x128xf32>
    %62 = arith.subf %58, %61 : vector<1x128xf32>
    %63 = math.exp %62 : vector<1x128xf32>
    %cst_37 = arith.constant dense<0.000000e+00> : vector<1xf32>
    %64 = vector.multi_reduction <add>, %63, %cst_37 [1] : vector<1x128xf32> to vector<1xf32>
    %65 = vector.shape_cast %64 : vector<1xf32> to vector<1x1xf32>
    %66 = math.log %65 : vector<1x1xf32>
    %67 = vector.broadcast %66 : vector<1x1xf32> to vector<1x128xf32>
    %68 = arith.subf %62, %67 : vector<1x128xf32>
    %c0_38 = arith.constant 0 : index
    %c0_39 = arith.constant 0 : index
    %c0_40 = arith.constant 0 : index
    %69 = vector.load %arg14[%c0_38, %c0_39, %c0_40] : memref<1x1x128xf32, #tpu.memory_space<vmem>>, vector<1x1x128xf32>
    %70 = vector.shape_cast %69 : vector<1x1x128xf32> to vector<1x128xf32>
    %71 = vector.shape_cast %68 : vector<1x128xf32> to vector<1x1x128xf32>
    tpu.vector_store %arg14[%c0_38, %c0_39, %c0_40], %71 {strides = array<i32>} : memref<1x1x128xf32, #tpu.memory_space<vmem>>, vector<1x1x128xf32>,
    return
  }
  func.func @transform_0(%arg0: i32) -> (i32, i32, i32) {
    %c0_i32 = arith.constant 0 : i32
    %c0_i32_0 = arith.constant 0 : i32
    %c0_i32_1 = arith.constant 0 : i32
    return %arg0, %c0_i32, %c0_i32_0 : i32, i32, i32
  }
  func.func @transform_1(%arg0: i32) -> (i32, i32) {
    %c0_i32 = arith.constant 0 : i32
    %c0_i32_0 = arith.constant 0 : i32
    %c0_i32_1 = arith.constant 0 : i32
    return %c0_i32, %c0_i32_0 : i32, i32
  }
  func.func @transform_2(%arg0: i32) -> (i32, i32) {
    %c0_i32 = arith.constant 0 : i32
    %c0_i32_0 = arith.constant 0 : i32
    %c0_i32_1 = arith.constant 0 : i32
    return %c0_i32, %c0_i32_0 : i32, i32
  }
  func.func @transform_3(%arg0: i32) -> (i32, i32) {
    %c0_i32 = arith.constant 0 : i32
    %c0_i32_0 = arith.constant 0 : i32
    %c0_i32_1 = arith.constant 0 : i32
    return %c0_i32, %c0_i32_0 : i32, i32
  }
  func.func @transform_4(%arg0: i32) -> (i32, i32) {
    %c0_i32 = arith.constant 0 : i32
    %c0_i32_0 = arith.constant 0 : i32
    %c0_i32_1 = arith.constant 0 : i32
    return %c0_i32, %c0_i32_0 : i32, i32
  }
  func.func @transform_5(%arg0: i32) -> (i32, i32) {
    %c0_i32 = arith.constant 0 : i32
    %c0_i32_0 = arith.constant 0 : i32
    %c0_i32_1 = arith.constant 0 : i32
    return %c0_i32, %c0_i32_0 : i32, i32
  }
  func.func @transform_6(%arg0: i32) -> (i32, i32) {
    %c0_i32 = arith.constant 0 : i32
    %c0_i32_0 = arith.constant 0 : i32
    %c0_i32_1 = arith.constant 0 : i32
    return %c0_i32, %c0_i32_0 : i32, i32
  }
  func.func @transform_7(%arg0: i32) -> (i32, i32) {
    %c0_i32 = arith.constant 0 : i32
    %c0_i32_0 = arith.constant 0 : i32
    %c0_i32_1 = arith.constant 0 : i32
    return %c0_i32, %c0_i32_0 : i32, i32
  }
  func.func @transform_8(%arg0: i32) -> (i32, i32) {
    %c0_i32 = arith.constant 0 : i32
    %c0_i32_0 = arith.constant 0 : i32
    %c0_i32_1 = arith.constant 0 : i32
    return %c0_i32, %c0_i32_0 : i32, i32
  }
  func.func @transform_9(%arg0: i32) -> (i32, i32) {
    %c0_i32 = arith.constant 0 : i32
    %c0_i32_0 = arith.constant 0 : i32
    %c0_i32_1 = arith.constant 0 : i32
    return %c0_i32, %c0_i32_0 : i32, i32
  }
  func.func @transform_10(%arg0: i32) -> (i32, i32) {
    %c0_i32 = arith.constant 0 : i32
    %c0_i32_0 = arith.constant 0 : i32
    %c0_i32_1 = arith.constant 0 : i32
    return %c0_i32, %c0_i32_0 : i32, i32
  }
  func.func @transform_11(%arg0: i32) -> (i32, i32) {
    %c0_i32 = arith.constant 0 : i32
    %c0_i32_0 = arith.constant 0 : i32
    %c0_i32_1 = arith.constant 0 : i32
    return %c0_i32, %c0_i32_0 : i32, i32
  }
  func.func @transform_12(%arg0: i32) -> (i32, i32) {
    %c0_i32 = arith.constant 0 : i32
    %c0_i32_0 = arith.constant 0 : i32
    %c0_i32_1 = arith.constant 0 : i32
    return %c0_i32, %c0_i32_0 : i32, i32
  }
  func.func @transform_13(%arg0: i32) -> (i32, i32, i32) {
    %c0_i32 = arith.constant 0 : i32
    %c0_i32_0 = arith.constant 0 : i32
    %c0_i32_1 = arith.constant 0 : i32
    return %arg0, %c0_i32, %c0_i32_0 : i32, i32, i32
  }
}

</mosaic_0001>

<bundles_post_ra>
// kernel: net_forward.1
= control target key start
LH: loop header
LB: loop body
LE: loop exit
PB: predicated region body
PF: predicated region fallthrough
CT: control target
= control target key end

     0   :  { %18 = vsyncpa [#allocation3], 0  ;;  %s2547_s0 = inlined_call_operand.vmem [shape: f32[2,28,28], index: 0, kind: input, shape index: {}]   ;;  %s2548_s1 = inlined_call_operand.vmem [shape: f32[140,120], index: 1, kind: input, shape index: {}]   ;;  %s2549_s2 = inlined_call_operand.vmem [shape: f32[140,120], index: 2, kind: input, shape index: {}]   ;;  %s2550_s3 = inlined_call_operand.vmem [shape: f32[24,24], index: 3, kind: input, shape index: {}]   ;;  %s2551_s4 = inlined_call_operand.vmem [shape: f32[1,120], index: 4, kind: input, shape index: {}]   ;;  %s2552_s5 = inlined_call_operand.vmem [shape: f32[600,80], index: 5, kind: input, shape index: {}]   ;;  %s2553_s6 = inlined_call_operand.vmem [shape: f32[600,80], index: 6, kind: input, shape index: {}]   ;;  %s2554_s7 = inlined_call_operand.vmem [shape: f32[8,8], index: 7, kind: input, shape index: {}]   ;;  %s2555_s8 = inlined_call_operand.vmem [shape: f32[1,80], index: 8, kind: input, shape index: {}]   ;;  %s2556_s9 = inlined_call_operand.vmem [shape: f32[320,50], index: 9, kind: input, shape index: {}]   ;;  %s2557_s10 = inlined_call_operand.vmem [shape: f32[1,50], index: 10, kind: input, shape index: {}]   ;;  %s2558_s11 = inlined_call_operand.vmem [shape: f32[50,128], index: 11, kind: input, shape index: {}]   ;;  %s2559_s12 = inlined_call_operand.vmem [shape: f32[1,128], index: 12, kind: input, shape index: {}]   ;;  %s2560_s13 = inlined_call_operand.hbm [shape: f32[2,1,128], index: 13, kind: output, shape index: {}]  }
   0x1   :  { %20 = vsyncpa [#allocation3 + $0x1], 0  ;;  %s1643_s25 = smov 0   ;;  %s1645_s26 = smov 0  }
   0x2   :  { %s1647_s27 = smov 0   ;;  %s1649_s28 = smov 0  }
   0x3 LB: > { %2566 = sst [smem:[#allocation5_spill]] %s1550_s25  ;;  %s1664_s29 = sadd.s32 4294967295, %s1562_s28   ;;  %s1562_s28 = sphi %s1649_s28, %s2575_s28   ;;  %s1558_s27 = sphi %s1647_s27, %s2577_s27   ;;  %s1554_s26 = sphi %s1645_s26, %s2579_s26   ;;  %s1550_s25 = sphi %s1643_s25, %s2578_s25  }
   0x4   : > { %2567 = sst [smem:[#allocation6_spill]] %s1558_s27  ;;  %s1405_s30 = sadd.s32 4294967294, %s1562_s28  }
   0x5   : > { %s1668_s14 = sadd.s32 1, %s1562_s28   ;;  %s311_s15 = sadd.s32 1, %s1558_s27 }
   0x6   : > { %2568 = sst [smem:[#allocation7_spill]] %s1668_s14  ;;  %s308_s16 = ssub.s32 %s1562_s28, %s1668_s14 }
   0x7   : > { %p321_p0 = scmp.ne.s32.totalorder %s1558_s27, %s1554_s26  ;;  %p309_p1 = scmp.eq.s32.totalorder %s308_s16, 0 }
   0x8   : > { %p322_p2 = scmp.eq.s32.totalorder %s1664_s29, 1  ;;  %p327_p3 = scmp.ne.s32.totalorder %s1554_s26, %s1550_s25 }
   0x9   : > { %p328_p4 = scmp.eq.s32.totalorder %s1405_s30, 1  ;;  %p1408_p7 = scmp.ge.s32.totalorder %s1562_s28, 1 }
   0xa   : > { %s1679_s17 = scalar_select %p309_p1, %s1558_s27, %s311_s15  }
   0xb   : > { %p1681_p5 = por %p322_p2, %p321_p0  ;;  %p1685_p6 = por %p328_p4, %p327_p3 }
   0xc   : > { %2569 = sst [smem:[#allocation8_spill]] %s1679_s17  ;;  %p390_p8 = scmp.lt.s32.totalorder %s1562_s28, 3 }
   0xd   : > { %s2571_s19 = scalar_select %p1685_p6, 1, 0 }
   0xe   : > { %p391_p9 = pnand %p1408_p7, %p390_p8 }
   0xf   : > { %2572 = sst [smem:[#allocation9_spill]] %s2571_s19  ;;  %p433_p10 = scmp.lt.s32.totalorder (!%p391_p9), %s1664_s29, 1 }
  0x10   : > { %394 = sbr.rel (%p391_p9) target bundleno = 1564 (0x61c), region = 72  ;;  %s1564_s27 = smov (!%p391_p9), 84  }
  0x11   : > { %s1565_s17 = smov (!%p391_p9), 28   ;;  %s1566_s21 = smov (!%p391_p9), 112  }
  0x12   : > { %s1568_s25 = smov (!%p391_p9), 96   ;;  %s1569_s19 = smov (!%p391_p9), 104  }
  0x15   : > { %v545_v0 = vld [vmem:[%s2548_s1 + $0x78] sm:$0xff]  ;;  %v544_v2 = vld [vmem:[%s2548_s1 + $0x70] sm:$0xff]  ;;  %s434_s15 = scalar_select %p433_p10, %s1664_s29, 1  ;;  %v543_v4 = vld [vmem:[%s2548_s1 + $0x68] sm:$0xff]  ;;  %vm480_vm0 = vcmask 1044480   ;;  %vm446_vm1 = vcmask 1046528  }
  0x16   : > { %v625_v1 = vld [vmem:[%s2549_s2 + $0x78] sm:$0xff]  ;;  %558 = vmatpush.msra.mxu0 %v545_v0  ;;  %v624_v3 = vld [vmem:[%s2549_s2 + $0x70] sm:$0xff]  ;;  %v623_v5 = vld [vmem:[%s2549_s2 + $0x68] sm:$0xff]  ;;  %vm463_vm2 = vcmask 1045504   ;;  %vm497_vm3 = vcmask 1043456   ;;  %vm548_vm4 = vcmask 97280  }
  0x17   : > { %631 = vmatpush.msra.mxu2 %v625_v1  ;;  %s1430_s22 = sshll.u32 %s434_s15, 5  ;;  %v542_v6 = vld [vmem:[%s2548_s1 + $0x60] sm:$0xff]  ;;  %v541_v15 = vld [vmem:[%s2548_s1 + $0x58] sm:$0xff]  ;;  %v540_v22 = vld [vmem:[%s2548_s1 + $0x50] sm:$0xff]  ;;  %vm514_vm5 = vcmask 228352   ;;  %vm518_vm6 = vcmask 457728  }
  0x18   : > { %559 = vmatpush.msra.mxu0 %v544_v2  ;;  %s1714_s30 = scalar_lea.vmem %s2547_s0, %s1430_s22  ;;  %v622_v7 = vld [vmem:[%s2549_s2 + $0x60] sm:$0xff]  ;;  %v621_v18 = vld [vmem:[%s2549_s2 + $0x58] sm:$0xff]  ;;  %v620_v27 = vld [vmem:[%s2549_s2 + $0x50] sm:$0xff]  ;;  %vm522_vm7 = vcmask 687104   ;;  %vm526_vm8 = vcmask 916480   ;;  %vm689_vm9 = vcmask 195584  }
  0x19   : > { %632 = vmatpush.msra.mxu2 %v624_v3  ;;  %v1723_v8 = vld [vmem:[%s1714_s30] sm:$0xff]  ;;  %v1726_v9 = vld [vmem:[%s1714_s30 + $0x8] sm:$0xff]  ;;  %v1729_v10 = vld [vmem:[%s1714_s30 + $0x10] sm:$0xff]  ;;  %vm773_vm10 = vcmask 785408   ;;  %vm768_vm11 = vcmask 982016   ;;  %vm771_vm12 = vcmask 850944  }
  0x1a   : > { %560 = vmatpush.msra.mxu0 %v543_v4  ;;  %v481_v11 = vrot.slane %v1723_v8, 3  ;;  %v482_v12 = vrot.slane %v1726_v9, 3  ;;  %v484_v13 = vrot.slane %v1729_v10, 3  ;;  %v447_v14 = vrot.slane %v1723_v8, 1  ;;  %v539_v30 = vld [vmem:[%s2548_s1 + $0x48] sm:$0xff]  ;;  %v538_v35 = vld [vmem:[%s2548_s1 + $0x40] sm:$0xff] }
  0x1b   : > { %633 = vmatpush.msra.mxu2 %v623_v5  ;;  %v448_v16 = vrot.slane %v1726_v9, 1  ;;  %v450_v17 = vrot.slane %v1729_v10, 1  ;;  %v464_v21 = vrot.slane %v1723_v8, 2  ;;  %v465_v26 = vrot.slane %v1726_v9, 2  ;;  %v619_v33 = vld [vmem:[%s2549_s2 + $0x48] sm:$0xff]  ;;  %v618_v39 = vld [vmem:[%s2549_s2 + $0x40] sm:$0xff] }
  0x1c   : > { %561 = vmatpush.msra.mxu0 %v542_v6  ;;  %v483_v19 = vsel %vm480_vm0, %v481_v11, %v482_v12  ;;  %v485_v20 = vsel %vm480_vm0, %v482_v12, %v484_v13  ;;  %v467_v29 = vrot.slane %v1729_v10, 2  ;;  %v499_v31 = vrot.slane %v1726_v9, 4  ;;  %v441_v40 = vld [vmem:[%s1714_s30 + $0x18] sm:$0xf]  ;;  %s1567_s30 = smov 56   ;;  %v536_v53 = vld [vmem:[%s2548_s1 + $0x30] sm:$0xff] }
  0x1d   : > { %634 = vmatpush.msra.mxu2 %v622_v7  ;;  %v1489_v23 = vpack.i.bf16 %v485_v20, %v483_v19  ;;  %v449_v24 = vsel %vm446_vm1, %v447_v14, %v448_v16  ;;  %v451_v25 = vsel %vm446_vm1, %v448_v16, %v450_v17  ;;  %v501_v32 = vrot.slane %v1729_v10, 4  ;;  %v537_v41 = vld [vmem:[%s2548_s1 + $0x38] sm:$0xff]  ;;  %v616_v54 = vld [vmem:[%s2549_s2 + $0x30] sm:$0xff]  ;;  %v535_v55 = vld [vmem:[%s2548_s1 + $0x28] sm:$0xff]  ;;  %s1572_s15 = smov 32  }
  0x1e   : > { %562 = vmatpush.msra.mxu0 %v541_v15  ;;  %v1479_v28 = vpack.i.bf16 %v451_v25, %v449_v24  ;;  %v498_v34 = vrot.slane %v1723_v8, 4  ;;  %v466_v36 = vsel %vm463_vm2, %v464_v21, %v465_v26  ;;  %v468_v37 = vsel %vm463_vm2, %v465_v26, %v467_v29  ;;  %v617_v43 = vld [vmem:[%s2549_s2 + $0x38] sm:$0xff]  ;;  %v615_v56 = vld [vmem:[%s2549_s2 + $0x28] sm:$0xff]  ;;  %v534_v57 = vld [vmem:[%s2548_s1 + $0x20] sm:$0xff] }
  0x1f   : > { %635 = vmatpush.msra.mxu2 %v621_v18  ;;  %1490 = vrot.lane.b32.xlu1 %v1489_v23, %s1564_s27  ;;  %v502_v38 = vsel %vm497_vm3, %v499_v31, %v501_v32  ;;  %v452_v42 = vrot.slane %v441_v40, 1  ;;  %v1484_v45 = vpack.i.bf16 %v468_v37, %v466_v36  ;;  %v486_v47 = vrot.slane %v441_v40, 3  ;;  %v614_v58 = vld [vmem:[%s2549_s2 + $0x20] sm:$0xff]  ;;  %v547_v59 = vld [vmem:[%s2548_s1 + $0x88] sm:$0xf]  ;;  %v533_v61 = vld [vmem:[%s2548_s1 + $0x18] sm:$0xff] }
  0x20   : > { %563 = vmatpush.msra.mxu0 %v540_v22  ;;  %1480 = vrot.lane.b32.xlu0 %v1479_v28, %s1565_s17  ;;  %v500_v44 = vsel %vm497_vm3, %v498_v34, %v499_v31  ;;  %v469_v48 = vrot.slane %v441_v40, 2  ;;  %v503_v49 = vrot.slane %v441_v40, 4  ;;  %v627_v60 = vld [vmem:[%s2549_s2 + $0x88] sm:$0xf]  ;;  %v613_v62 = vld [vmem:[%s2549_s2 + $0x18] sm:$0xff]  ;;  %v546_v63 = vld [vmem:[%s2548_s1 + $0x80] sm:$0xff] }
  0x21   : > { %636 = vmatpush.msra.mxu2 %v620_v27  ;;  %507 = vrot.lane.b32.xlu2 %v502_v38, %s1566_s21  ;;  %v453_v46 = vsel %vm446_vm1, %v450_v17, %v452_v42  ;;  %v487_v50 = vsel %vm480_vm0, %v484_v13, %v486_v47  ;;  %v626_v0 = vld [vmem:[%s2549_s2 + $0x80] sm:$0xff]  ;;  %v532_v1 = vld [vmem:[%s2548_s1 + $0x10] sm:$0xff]  ;;  %v531_v3 = vld [vmem:[%s2548_s1 + $0x8] sm:$0xff]  ;;  %vm850_vm13 = vcmask 719872   ;;  %vm1130_vm14 = vcmask 64512  }
  0x22   : > { %564 = vmatpush.msra.mxu0 %v539_v30  ;;  %v470_v51 = vsel %vm463_vm2, %v467_v29, %v469_v48  ;;  %v504_v52 = vsel %vm497_vm3, %v501_v32, %v503_v49  ;;  %1411 = vmatpush.msk.msra.mxu1 %vm497_vm3, %v547_v59  ;;  %v612_v2 = vld [vmem:[%s2549_s2 + $0x10] sm:$0xff]  ;;  %v611_v4 = vld [vmem:[%s2549_s2 + $0x8] sm:$0xff]  ;;  %v530_v5 = vld [vmem:[%s2548_s1] sm:$0xff]  ;;  %vm1177_vm15 = vcmask 654336  }
  0x23   : > { %637 = vmatpush.msra.mxu2 %v619_v33  ;;  %1415 = vmatpush.msk.msra.mxu3 %vm497_vm3, %v627_v60  ;;  %v610_v6 = vld [vmem:[%s2549_s2] sm:$0xff]  ;;  %v838_v59 = vld [vmem:[%s2552_s5 + $0x1f8] sm:$0xff] }
  0x24   : > { %565 = vmatpush.msra.mxu0 %v538_v35  ;;  %599 = vmatpush.msra.mxu1 %v546_v63  ;;  %v790_v60 = vld [vmem:[%s2552_s5 + $0x78] sm:$0xff] }
  0x25   : > { %638 = vmatpush.msra.mxu2 %v618_v39  ;;  %672 = vmatpush.msra.mxu3 %v626_v0  ;;  %v836_v0 = vld [vmem:[%s2552_s5 + $0x1e8] sm:$0xff] }
  0x26   : > { %566 = vmatpush.msra.mxu0 %v537_v41 }
  0x27   : > { %639 = vmatpush.msra.mxu2 %v617_v43  ;;  %505 = vrot.lane.b32.xlu1 %v500_v44, %s1566_s21 }
  0x28   : > { %1485 = vrot.lane.b32.xlu0 %v1484_v45, %s1567_s30  ;;  %567 = vmatpush.msra.mxu0 %v536_v53 }
  0x29   : > { %458 = vrot.lane.b32.xlu2 %v453_v46, %s1565_s17  ;;  %640 = vmatpush.msra.mxu2 %v616_v54  ;;  %s1346_s17 = scalar_lea.hbm %s2560_s13, %s1664_s29  ;;  %s1520_s29 = scalar_lea.hbm %s2560_s13, 2 }
  0x2a   : > { %568 = vmatpush.msra.mxu0 %v535_v55  ;;  %v686_v55 = vld [vmem:[%s2550_s3] sm:$0xff]  ;;  %853 = vmatpush.msrb.mxu3 %v790_v60  ;;  %v826_v60 = vld [vmem:[%s2552_s5 + $0x198] sm:$0xff]  ;;  %s1350_s22 = sshll.u32 %s1346_s17, 4  ;;  %s1351_s22 = int_to_ptr.hbm [resolvable:$true] %s1350_s22 }
  0x2b   : > { %641 = vmatpush.msra.mxu2 %v615_v56  ;;  %v687_v56 = vld [vmem:[%s2550_s3 + $0x8] sm:$0xff]  ;;  %s1514_s24 = sshra.s32 %s1351_s22, 4  ;;  %s1515_s24 = int_to_ptr.hbm [resolvable:$true] %s1514_s24 }
  0x2c   : > { %569 = vmatpush.msra.mxu0 %v534_v57  ;;  %v688_v57 = vld [vmem:[%s2550_s3 + $0x10] sm:$0xff]  ;;  %s1516_s14 = scalar_lea.hbm %s1515_s24, 1  ;;  %p1521_p0 = scmp.lt.s32.totalorder %s1515_s24, %s2560_s13 }
  0x2d   : > { %642 = vmatpush.msra.mxu2 %v614_v58  ;;  %p1517_p11 = scmp.ne.s32.totalorder %s1515_s24, %s1516_s14  ;;  %p1522_p1 = scmp.lt.s32.totalorder %s1520_s29, %s1516_s14 }
  0x2e   : > { %570 = vmatpush.msra.mxu0 %v533_v61  ;;  %v837_v61 = vld [vmem:[%s2552_s5 + $0x1f0] sm:$0xff] }
  0x2f   : > { %492 = vrot.lane.b32.xlu1 %v487_v50, %s1564_s27  ;;  %643 = vmatpush.msra.mxu2 %v613_v62  ;;  %v789_v62 = vld [vmem:[%s2552_s5 + $0x70] sm:$0xff]  ;;  %s1570_s27 = smov 120   ;;  %p1518_p12 = pnand %p1517_p11, %p1681_p5 }
  0x30   : > { %475 = vrot.lane.b32.xlu0 %v470_v51, %s1567_s30  ;;  %571 = vmatpush.msra.mxu0 %v532_v1  ;;  %v788_v1 = vld [vmem:[%s2552_s5 + $0x68] sm:$0xff]  ;;  %p1523_p2 = por %p1522_p1, %p1521_p0 }
  0x31   : > { %509 = vrot.lane.b32.xlu2 %v504_v52, %s1566_s21  ;;  %644 = vmatpush.msra.mxu2 %v612_v2  ;;  %v806_v2 = vld [vmem:[%s2552_s5 + $0xf8] sm:$0xff]  ;;  %p1519_p13 = pneg %p1518_p12 }
  0x32   : > { %572 = vmatpush.msra.mxu0 %v531_v3  ;;  %854 = vmatpush.msrb.mxu3 %v789_v62  ;;  %v835_v3 = vld [vmem:[%s2552_s5 + $0x1e0] sm:$0xff]  ;;  %v778_v62 = vld [vmem:[%s2552_s5 + $0x18] sm:$0xff] }
  0x33   : > { %645 = vmatpush.msra.mxu2 %v611_v4  ;;  %v822_v4 = vld [vmem:[%s2552_s5 + $0x178] sm:$0xff]  ;;  %p1524_p3 = pnand %p1523_p2, %p1519_p13 }
  0x34   : > { %573 = vmatpush.msra.mxu0 %v530_v5  ;;  %v787_v5 = vld [vmem:[%s2552_s5 + $0x60] sm:$0xff]  ;;  %855 = vmatpush.msrb.mxu3 %v788_v1  ;;  %v777_v1 = vld [vmem:[%s2552_s5 + $0x10] sm:$0xff] }
  0x35   : > { %646 = vmatpush.msra.mxu2 %v610_v6  ;;  %v805_v6 = vld [vmem:[%s2552_s5 + $0xf0] sm:$0xff] }
  0x36   : > { %893 = vmatpush.msrb.mxu0 %v822_v4  ;;  %856 = vmatpush.msrb.mxu3 %v787_v5  ;;  %v824_v4 = vld [vmem:[%s2552_s5 + $0x188] sm:$0xff] }
  0x37   : > { %913 = vmatpush.msrb.mxu2 %v838_v59  ;;  %v813_v59 = vld [vmem:[%s2552_s5 + $0x130] sm:$0xff] }
  0x39   : > { %914 = vmatpush.msrb.mxu2 %v837_v61  ;;  %v796_v61 = vld [vmem:[%s2552_s5 + $0xa8] sm:$0xff] }
  0x3b   : > { %915 = vmatpush.msrb.mxu2 %v836_v0  ;;  %v825_v0 = vld [vmem:[%s2552_s5 + $0x190] sm:$0xff] }
  0x3d   : > { %916 = vmatpush.msrb.mxu2 %v835_v3 }
  0x7b   : > { %v508_v12 = vpop.permute.xlu2 %507 }
  0x83   : > { %v459_v24 = vpop.permute.xlu2 %458 }
  0x84   : > { %v517_v28 = vsel %vm514_vm5, %v1729_v10, %v459_v24 }
  0x8b   : > { %v510_v32 = vpop.permute.xlu2 %509 }
  0x91   : > { %v1491_v7 = vpop.permute.xlu1 %1490 }
  0x92   : > { %v1481_v11 = vpop.permute.xlu0 %1480  ;;  %v1492_v17 = vunpack.i.l.bf16 %v1491_v7  ;;  %v1493_v27 = vunpack.i.h.bf16 %v1491_v7  ;;  %v821_v7 = vld [vmem:[%s2552_s5 + $0x170] sm:$0xff] }
  0x93   : > { %v1482_v13 = vunpack.i.l.bf16 %v1481_v11  ;;  %v1483_v18 = vunpack.i.h.bf16 %v1481_v11  ;;  %v804_v11 = vld [vmem:[%s2552_s5 + $0xe8] sm:$0xff]  ;;  %894 = vmatpush.msrb.mxu0 %v821_v7  ;;  %v795_v7 = vld [vmem:[%s2552_s5 + $0xa0] sm:$0xff] }
  0x95   : > { %v515_v19 = vsel %vm514_vm5, %v1723_v8, %v1482_v13  ;;  %v516_v25 = vsel %vm514_vm5, %v1726_v9, %v1483_v18  ;;  %v834_v13 = vld [vmem:[%s2552_s5 + $0x1d8] sm:$0xff]  ;;  %v785_v18 = vld [vmem:[%s2552_s5 + $0x50] sm:$0xff] }
  0x96   : > { %917 = vmatpush.msrb.mxu2 %v834_v13  ;;  %v1016_v13 = vld [vmem:[%s2553_s6 + $0x1f8] sm:$0xff] }
  0x99   : > { %v506_v14 = vpop.permute.xlu1 %505 }
  0x9a   : > { %v1486_v15 = vpop.permute.xlu0 %1485  ;;  %1412 = vmatmul.msk.f32.vlgmr.msra.gmra.mxu1 %vm548_vm4, %v506_v14  ;;  %1416 = vmatmul.msk.f32.vlgmr.msra.gmra.mxu3 %vm548_vm4, %v506_v14 }
  0x9b   : > { %v1487_v16 = vunpack.i.l.bf16 %v1486_v15  ;;  %v1488_v20 = vunpack.i.h.bf16 %v1486_v15  ;;  %v803_v15 = vld [vmem:[%s2552_s5 + $0xe0] sm:$0xff] }
  0x9d   : > { %v519_v21 = vsel %vm518_vm6, %v515_v19, %v1487_v16  ;;  %v520_v26 = vsel %vm518_vm6, %v516_v25, %v1488_v20  ;;  %v819_v16 = vld [vmem:[%s2552_s5 + $0x160] sm:$0xff]  ;;  %v802_v19 = vld [vmem:[%s2552_s5 + $0xd8] sm:$0xff] }
  0x9e   : > { %v523_v22 = vsel %vm522_vm7, %v519_v21, %v1492_v17  ;;  %v524_v8 = vsel %vm522_vm7, %v520_v26, %v1493_v27  ;;  %v833_v17 = vld [vmem:[%s2552_s5 + $0x1d0] sm:$0xff]  ;;  %v818_v20 = vld [vmem:[%s2552_s5 + $0x158] sm:$0xff]  ;;  %v1494_v26 = vld [vmem:[%s2551_s4] ss:$0 sm:$0xff] }
  0x9f   : > { %v527_v23 = vsel %vm526_vm8, %v523_v22, %v506_v14  ;;  %v528_v30 = vsel %vm526_vm8, %v524_v8, %v508_v12  ;;  %v786_v14 = vld [vmem:[%s2552_s5 + $0x58] sm:$0xff]  ;;  %v832_v22 = vld [vmem:[%s2552_s5 + $0x1c8] sm:$0xff]  ;;  %918 = vmatpush.msrb.mxu2 %v833_v17  ;;  %v801_v27 = vld [vmem:[%s2552_s5 + $0xd0] sm:$0xff] }
  0xa0   : > { %574 = vmatmul.f32.vlgmr.msra.gmra.mxu0 %v527_v23  ;;  %647 = vmatmul.f32.vlgmr.msra.gmra.mxu2 %v527_v23  ;;  %v784_v23 = vld [vmem:[%s2552_s5 + $0x48] sm:$0xff]  ;;  %v817_v8 = vld [vmem:[%s2552_s5 + $0x150] sm:$0xff] }
  0xa1   : > { %v493_v31 = vpop.permute.xlu1 %492  ;;  %857 = vmatpush.msrb.mxu3 %v786_v14  ;;  %919 = vmatpush.msrb.mxu2 %v832_v22  ;;  %v775_v14 = vld [vmem:[%s2552_s5] sm:$0xff]  ;;  %v849_v17 = vld [vmem:[%s2552_s5 + $0x250] sm:$0xff]  ;;  %v1014_v22 = vld [vmem:[%s2553_s6 + $0x1e8] sm:$0xff] }
  0xa2   : > { %1413 = vmatmul.msk.f32.gmra.mxu1 %vm548_vm4, %v508_v12  ;;  %1417 = vmatmul.msk.f32.gmra.mxu3 %vm548_vm4, %v508_v12  ;;  %v476_v29 = vpop.permute.xlu0 %475  ;;  %v820_v12 = vld [vmem:[%s2552_s5 + $0x168] sm:$0xff] }
  0xa3   : > { %v521_v9 = vsel %vm518_vm6, %v517_v28, %v476_v29  ;;  %895 = vmatpush.msrb.mxu0 %v820_v12  ;;  %858 = vmatpush.msrb.mxu3 %v785_v18  ;;  %v831_v28 = vld [vmem:[%s2552_s5 + $0x1c0] sm:$0xff]  ;;  %v1015_v18 = vld [vmem:[%s2553_s6 + $0x1f0] sm:$0xff] }
  0xa4   : > { %v525_v33 = vsel %vm522_vm7, %v521_v9, %v493_v31  ;;  %v783_v29 = vld [vmem:[%s2552_s5 + $0x40] sm:$0xff]  ;;  %v800_v31 = vld [vmem:[%s2552_s5 + $0xc8] sm:$0xff]  ;;  %920 = vmatpush.msrb.mxu2 %v831_v28  ;;  %v846_v28 = vld [vmem:[%s2552_s5 + $0x238] sm:$0xff] }
  0xa5   : > { %v529_v34 = vsel %vm526_vm8, %v525_v33, %v510_v32  ;;  %896 = vmatpush.msrb.mxu0 %v819_v16  ;;  %859 = vmatpush.msrb.mxu3 %v784_v23  ;;  %v823_v12 = vld [vmem:[%s2552_s5 + $0x180] sm:$0xff]  ;;  %v810_v16 = vld [vmem:[%s2552_s5 + $0x118] sm:$0xff]  ;;  %v792_v23 = vld [vmem:[%s2552_s5 + $0x88] sm:$0xff] }
  0xa7   : > { %897 = vmatpush.msrb.mxu0 %v818_v20  ;;  %860 = vmatpush.msrb.mxu3 %v783_v29  ;;  %v809_v20 = vld [vmem:[%s2552_s5 + $0x110] sm:$0xff]  ;;  %v984_v29 = vld [vmem:[%s2553_s6 + $0xf8] sm:$0xff] }
  0xa8   : > { %577 = vmatmul.f32.gmra.mxu0 %v528_v30  ;;  %650 = vmatmul.f32.gmra.mxu2 %v528_v30 }
  0xa9   : > { %898 = vmatpush.msrb.mxu0 %v817_v8  ;;  %v807_v8 = vld [vmem:[%s2552_s5 + $0x100] sm:$0xff] }
  0xaa   : > { %1414 = vmatmul.msk.f32.gmra.mxu1 %vm548_vm4, %v510_v32  ;;  %1418 = vmatmul.msk.f32.gmra.mxu3 %vm548_vm4, %v510_v32  ;;  %v816_v32 = vld [vmem:[%s2552_s5 + $0x148] sm:$0xff]  ;;  %vm1323_vm4 = vcmask 1040384  }
  0xab   : > { %899 = vmatpush.msrb.mxu0 %v816_v32  ;;  %v983_v32 = vld [vmem:[%s2553_s6 + $0xf0] sm:$0xff] }
  0xb0   : > { %580 = vmatmul.f32.gmra.mxu0 %v529_v34  ;;  %653 = vmatmul.f32.gmra.mxu2 %v529_v34  ;;  %v830_v34 = vld [vmem:[%s2552_s5 + $0x1b8] sm:$0xff] }
  0xb1   : > { %921 = vmatpush.msrb.mxu2 %v830_v34  ;;  %v1011_v34 = vld [vmem:[%s2553_s6 + $0x1d0] sm:$0xff] }
 0x117   : > { %v601_v35 = vpop.f32.mrf.mxu1 }
 0x11d   : > { %v575_v10 = vpop.f32.mrf.mxu0  ;;  %v674_v36 = vpop.f32.mrf.mxu3 }
 0x11e   : > { %v602_v52 = vadd.f32 %v601_v35, %v575_v10  ;;  %v782_v10 = vld [vmem:[%s2552_s5 + $0x38] sm:$0xff] }
 0x11f   : > { %v604_v39 = vpop.f32.mrf.mxu1  ;;  %861 = vmatpush.msrb.mxu3 %v782_v10  ;;  %v844_v10 = vld [vmem:[%s2552_s5 + $0x228] sm:$0xff] }
 0x123   : > { %v648_v37 = vpop.f32.mrf.mxu2 }
 0x124   : > { %v675_v49 = vadd.f32 %v674_v36, %v648_v37  ;;  %v799_v36 = vld [vmem:[%s2552_s5 + $0xc0] sm:$0xff] }
 0x125   : > { %v578_v38 = vpop.f32.mrf.mxu0  ;;  %v677_v40 = vpop.f32.mrf.mxu3  ;;  %v815_v37 = vld [vmem:[%s2552_s5 + $0x140] sm:$0xff] }
 0x126   : > { %v605_v50 = vadd.f32 %v604_v39, %v578_v38  ;;  %v683_v54 = vmax.f32 %v602_v52, %v675_v49  ;;  %v829_v39 = vld [vmem:[%s2552_s5 + $0x1b0] sm:$0xff]  ;;  %900 = vmatpush.msrb.mxu0 %v815_v37  ;;  %v1010_v37 = vld [vmem:[%s2553_s6 + $0x1c8] sm:$0xff] }
 0x127   : > { %v607_v42 = vpop.f32.mrf.mxu1  ;;  %922 = vmatpush.msrb.mxu2 %v829_v39  ;;  %v981_v39 = vld [vmem:[%s2553_s6 + $0xe0] sm:$0xff] }
 0x12b   : > { %v651_v41 = vpop.f32.mrf.mxu2 }
 0x12c   : > { %v678_v46 = vadd.f32 %v677_v40, %v651_v41  ;;  %v781_v40 = vld [vmem:[%s2552_s5 + $0x30] sm:$0xff] }
 0x12d   : > { %v581_v43 = vpop.f32.mrf.mxu0  ;;  %v680_v44 = vpop.f32.mrf.mxu3  ;;  %862 = vmatpush.msrb.mxu3 %v781_v40  ;;  %v997_v40 = vld [vmem:[%s2553_s6 + $0x160] sm:$0xff] }
 0x12e   : > { %v608_v47 = vadd.f32 %v607_v42, %v581_v43  ;;  %v684_v53 = vmax.f32 %v605_v50, %v678_v46  ;;  %v798_v42 = vld [vmem:[%s2552_s5 + $0xb8] sm:$0xff]  ;;  %v780_v46 = vld [vmem:[%s2552_s5 + $0x28] sm:$0xff]  ;;  %v797_v50 = vld [vmem:[%s2552_s5 + $0xb0] sm:$0xff] }
 0x12f   : > { %v814_v43 = vld [vmem:[%s2552_s5 + $0x138] sm:$0xff]  ;;  %863 = vmatpush.msrb.mxu3 %v780_v46 }
 0x130   : > { %901 = vmatpush.msrb.mxu0 %v814_v43  ;;  %v980_v43 = vld [vmem:[%s2553_s6 + $0xd8] sm:$0xff] }
 0x131   : > { %v1008_v46 = vld [vmem:[%s2553_s6 + $0x1b8] sm:$0xff] }
 0x132   : > { %902 = vmatpush.msrb.mxu0 %v813_v59  ;;  %v976_v59 = vld [vmem:[%s2553_s6 + $0xb8] sm:$0xff] }
 0x133   : > { %v654_v45 = vpop.f32.mrf.mxu2 }
 0x134   : > { %v681_v48 = vadd.f32 %v680_v44, %v654_v45  ;;  %v828_v45 = vld [vmem:[%s2552_s5 + $0x1a8] sm:$0xff] }
 0x135   : > { %923 = vmatpush.msrb.mxu2 %v828_v45  ;;  %v996_v45 = vld [vmem:[%s2553_s6 + $0x158] sm:$0xff] }
 0x136   : > { %v685_v51 = vmax.f32 %v608_v47, %v681_v48 }
 0x138   : > { %712 = vmatpush.msrb.mxu1 %v685_v51 }
 0x13a   : > { %713 = vmatpush.msrb.mxu1 %v684_v53 }
 0x13c   : > { %714 = vmatpush.msrb.mxu1 %v683_v54  ;;  %v827_v54 = vld [vmem:[%s2552_s5 + $0x1a0] sm:$0xff] }
 0x13d   : > { %1419 = vmatmul.msk.f32.vlgmr.msrb.gmra.mxu1 %vm689_vm9, %v686_v55  ;;  %924 = vmatpush.msrb.mxu2 %v827_v54  ;;  %v1006_v54 = vld [vmem:[%s2553_s6 + $0x1a8] sm:$0xff] }
 0x13e   : > { %873 = vmatpush.msra.mxu1 %v806_v2 }
 0x13f   : > { %925 = vmatpush.msrb.mxu2 %v826_v60  ;;  %v992_v60 = vld [vmem:[%s2553_s6 + $0x138] sm:$0xff] }
 0x140   : > { %874 = vmatpush.msra.mxu1 %v805_v6  ;;  %v776_v6 = vld [vmem:[%s2552_s5 + $0x8] sm:$0xff] }
 0x141   : > { %926 = vmatpush.msrb.mxu2 %v825_v0  ;;  %v1003_v0 = vld [vmem:[%s2553_s6 + $0x190] sm:$0xff] }
 0x142   : > { %875 = vmatpush.msra.mxu1 %v804_v11  ;;  %v811_v11 = vld [vmem:[%s2552_s5 + $0x120] sm:$0xff] }
 0x143   : > { %927 = vmatpush.msrb.mxu2 %v824_v4  ;;  %v973_v4 = vld [vmem:[%s2553_s6 + $0xa0] sm:$0xff] }
 0x144   : > { %876 = vmatpush.msra.mxu1 %v803_v15  ;;  %v794_v15 = vld [vmem:[%s2552_s5 + $0x98] sm:$0xff] }
 0x145   : > { %1420 = vmatmul.msk.f32.gmra.mxu1 %vm689_vm9, %v687_v56  ;;  %928 = vmatpush.msrb.mxu2 %v823_v12  ;;  %v971_v12 = vld [vmem:[%s2553_s6 + $0x90] sm:$0xff] }
 0x146   : > { %877 = vmatpush.msra.mxu1 %v802_v19  ;;  %v793_v19 = vld [vmem:[%s2552_s5 + $0x90] sm:$0xff] }
 0x147   : > { %1088 = vmatpush.msra.mxu2 %v1016_v13  ;;  %v987_v13 = vld [vmem:[%s2553_s6 + $0x110] sm:$0xff] }
 0x148   : > { %878 = vmatpush.msra.mxu1 %v801_v27  ;;  %v791_v27 = vld [vmem:[%s2552_s5 + $0x80] sm:$0xff] }
 0x149   : > { %1089 = vmatpush.msra.mxu2 %v1015_v18 }
 0x14a   : > { %879 = vmatpush.msra.mxu1 %v800_v31  ;;  %v845_v31 = vld [vmem:[%s2552_s5 + $0x230] sm:$0xff] }
 0x14b   : > { %1090 = vmatpush.msra.mxu2 %v1014_v22  ;;  %v968_v22 = vld [vmem:[%s2553_s6 + $0x78] sm:$0xff] }
 0x14c   : > { %880 = vmatpush.msra.mxu1 %v799_v36  ;;  %v998_v36 = vld [vmem:[%s2553_s6 + $0x168] sm:$0xff] }
 0x14d   : > { %1421 = vmatmul.msk.f32.gmra.mxu1 %vm689_vm9, %v688_v57 }
 0x14e   : > { %881 = vmatpush.msra.mxu1 %v798_v42  ;;  %v842_v42 = vld [vmem:[%s2552_s5 + $0x218] sm:$0xff] }
 0x150   : > { %882 = vmatpush.msra.mxu1 %v797_v50  ;;  %v1007_v50 = vld [vmem:[%s2553_s6 + $0x1b0] sm:$0xff] }
 0x152   : > { %883 = vmatpush.msra.mxu1 %v796_v61  ;;  %v1004_v61 = vld [vmem:[%s2553_s6 + $0x198] sm:$0xff] }
 0x154   : > { %884 = vmatpush.msra.mxu1 %v795_v7  ;;  %v972_v7 = vld [vmem:[%s2553_s6 + $0x98] sm:$0xff] }
 0x156   : > { %885 = vmatpush.msra.mxu1 %v794_v15  ;;  %v986_v15 = vld [vmem:[%s2553_s6 + $0x108] sm:$0xff] }
 0x158   : > { %886 = vmatpush.msra.mxu1 %v793_v19 }
 0x15a   : > { %887 = vmatpush.msra.mxu1 %v792_v23 }
 0x15c   : > { %888 = vmatpush.msra.mxu1 %v791_v27 }
 0x15e   : > { %1048 = vmatpush.msrb.mxu1 %v984_v29  ;;  %v963_v29 = vld [vmem:[%s2553_s6 + $0x50] sm:$0xff] }
 0x160   : > { %1049 = vmatpush.msrb.mxu1 %v983_v32  ;;  %v959_v32 = vld [vmem:[%s2553_s6 + $0x30] sm:$0xff] }
 0x1ba   : > { %v1877_v58 = vpop.f32.mrf.mxu1 }
 0x1c2   : > { %v719_v63 = vpop.f32.mrf.mxu1 }
 0x1c3   : > { %v727_v24 = vrot.slane %v719_v63, 4 }
 0x1ca   : > { %v722_v21 = vpop.f32.mrf.mxu1 }
 0x1cb   : > { %v728_v25 = vrot.slane %v722_v21, 4  ;;  %v848_v21 = vld [vmem:[%s2552_s5 + $0x248] sm:$0xff] }
 0x1cd   : > { %v729_v30 = vsel %vm497_vm3, %v727_v24, %v728_v25  ;;  %v733_v9 = vmax.f32 %v719_v63, %v728_v25  ;;  %v812_v63 = vld [vmem:[%s2552_s5 + $0x128] sm:$0xff]  ;;  %v847_v25 = vld [vmem:[%s2552_s5 + $0x240] sm:$0xff] }
 0x1ce   : > { %v732_v33 = vmax.f32 %v1877_v58, %v729_v30  ;;  %v779_v58 = vld [vmem:[%s2552_s5 + $0x20] sm:$0xff]  ;;  %903 = vmatpush.msrb.mxu0 %v812_v63  ;;  %v808_v24 = vld [vmem:[%s2552_s5 + $0x108] sm:$0xff]  ;;  %v1000_v30 = vld [vmem:[%s2553_s6 + $0x178] sm:$0xff] }
 0x1cf   : > { %v739_v35 = vadd.f32 %v1494_v26, %v733_v9  ;;  %864 = vmatpush.msrb.mxu3 %v779_v58  ;;  %v1012_v9 = vld [vmem:[%s2553_s6 + $0x1d8] sm:$0xff]  ;;  %v1005_v58 = vld [vmem:[%s2553_s6 + $0x1a0] sm:$0xff]  ;;  %v991_v63 = vld [vmem:[%s2553_s6 + $0x130] sm:$0xff] }
 0x1d0   : > { %v738_v38 = vadd.f32 %v1494_v26, %v732_v33  ;;  %904 = vmatpush.msrb.mxu0 %v811_v11  ;;  %v1013_v26 = vld [vmem:[%s2553_s6 + $0x1e0] sm:$0xff]  ;;  %v999_v33 = vld [vmem:[%s2553_s6 + $0x170] sm:$0xff]  ;;  %v988_v11 = vld [vmem:[%s2553_s6 + $0x118] sm:$0xff] }
 0x1d1   : > { %v741_v41 = vmax.f32 %v739_v35, 0.0  ;;  %865 = vmatpush.msrb.mxu3 %v778_v62  ;;  %1091 = vmatpush.msra.mxu2 %v1013_v26  ;;  %v982_v35 = vld [vmem:[%s2553_s6 + $0xe8] sm:$0xff]  ;;  %v975_v62 = vld [vmem:[%s2553_s6 + $0xb0] sm:$0xff]  ;;  %v965_v26 = vld [vmem:[%s2553_s6 + $0x60] sm:$0xff] }
 0x1d2   : > { %v1998_v44 = vmax.f32 %v738_v38, 0.0  ;;  %905 = vmatpush.msrb.mxu0 %v810_v16  ;;  %v843_v38 = vld [vmem:[%s2552_s5 + $0x220] sm:$0xff]  ;;  %1050 = vmatpush.msrb.mxu1 %v982_v35  ;;  %v955_v35 = vld [vmem:[%s2553_s6 + $0x10] sm:$0xff] }
 0x1d3   : > { %v763_v47 = vrot.slane %v741_v41, 4  ;;  %v757_v48 = vrot.slane %v741_v41, 3  ;;  %v745_v49 = vrot.slane %v741_v41, 1  ;;  %v751_v3 = vrot.slane %v741_v41, 2  ;;  %866 = vmatpush.msrb.mxu3 %v777_v1  ;;  %1092 = vmatpush.msra.mxu2 %v1012_v9  ;;  %v1009_v41 = vld [vmem:[%s2553_s6 + $0x1c0] sm:$0xff]  ;;  %v974_v1 = vld [vmem:[%s2553_s6 + $0xa8] sm:$0xff] }
 0x1d4   : > { %v762_v51 = vrot.slane %v1998_v44, 4  ;;  %v756_v52 = vrot.slane %v1998_v44, 3  ;;  %v744_v53 = vrot.slane %v1998_v44, 1  ;;  %v750_v2 = vrot.slane %v1998_v44, 2  ;;  %906 = vmatpush.msrb.mxu0 %v809_v20  ;;  %1051 = vmatpush.msrb.mxu1 %v981_v39  ;;  %v969_v16 = vld [vmem:[%s2553_s6 + $0x80] sm:$0xff]  ;;  %v1026_v39 = vld [vmem:[%s2553_s6 + $0x248] sm:$0xff] }
 0x1d5   : > { %867 = vmatpush.msrb.mxu3 %v776_v6  ;;  %1093 = vmatpush.msra.mxu2 %v1011_v34  ;;  %v1001_v6 = vld [vmem:[%s2553_s6 + $0x180] sm:$0xff] }
 0x1d6   : > { %v764_v55 = vsel %vm497_vm3, %v762_v51, %v763_v47  ;;  %v758_v56 = vsel %vm480_vm0, %v756_v52, %v757_v48  ;;  %v746_v57 = vsel %vm446_vm1, %v744_v53, %v745_v49  ;;  %v752_v5 = vsel %vm463_vm2, %v750_v2, %v751_v3  ;;  %907 = vmatpush.msrb.mxu0 %v808_v24  ;;  %v841_v47 = vld [vmem:[%s2552_s5 + $0x210] sm:$0xff]  ;;  %v840_v51 = vld [vmem:[%s2552_s5 + $0x208] sm:$0xff]  ;;  %v961_v9 = vld [vmem:[%s2553_s6 + $0x40] sm:$0xff] }
 0x1d7   : > { %765 = vrot.lane.b32.xlu1 %v764_v55, %s1568_s25  ;;  %759 = vrot.lane.b32.xlu2 %v758_v56, %s1569_s19  ;;  %v979_v48 = vld [vmem:[%s2553_s6 + $0xd0] sm:$0xff]  ;;  %v978_v52 = vld [vmem:[%s2553_s6 + $0xc8] sm:$0xff]  ;;  %s1571_s19 = smov 80   ;;  %vm1179_vm0 = vcmask 261120   ;;  %vm1223_vm1 = vcmask 523264   ;;  %vm1299_vm2 = vcmask 1041408  }
 0x1d8   : > { %747 = vrot.lane.b32.xlu0 %v746_v57, %s1570_s27  ;;  %868 = vmatpush.msrb.mxu3 %v775_v14  ;;  %v995_v49 = vld [vmem:[%s2553_s6 + $0x150] sm:$0xff]  ;;  %v994_v53 = vld [vmem:[%s2553_s6 + $0x148] sm:$0xff]  ;;  %v839_v55 = vld [vmem:[%s2552_s5 + $0x200] sm:$0xff]  ;;  %vm1295_vm3 = vcmask 408576  }
 0x1d9   : > { %908 = vmatpush.msrb.mxu0 %v807_v8  ;;  %1094 = vmatpush.msra.mxu2 %v1010_v37  ;;  %v977_v56 = vld [vmem:[%s2553_s6 + $0xc0] sm:$0xff]  ;;  %v990_v2 = vld [vmem:[%s2553_s6 + $0x128] sm:$0xff]  ;;  %v967_v24 = vld [vmem:[%s2553_s6 + $0x70] sm:$0xff] }
 0x1da   : > { %938 = vmatpush.msra.mxu3 %v849_v17  ;;  %1052 = vmatpush.msrb.mxu1 %v980_v43  ;;  %v993_v57 = vld [vmem:[%s2553_s6 + $0x140] sm:$0xff]  ;;  %v1002_v3 = vld [vmem:[%s2553_s6 + $0x188] sm:$0xff] }
 0x1db   : > { %1068 = vmatpush.msra.mxu0 %v1000_v30  ;;  %1095 = vmatpush.msra.mxu2 %v1009_v41  ;;  %v970_v14 = vld [vmem:[%s2553_s6 + $0x88] sm:$0xff]  ;;  %v985_v17 = vld [vmem:[%s2553_s6 + $0x100] sm:$0xff]  ;;  %v1024_v41 = vld [vmem:[%s2553_s6 + $0x238] sm:$0xff] }
 0x1dc   : > { %939 = vmatpush.msra.mxu3 %v848_v21  ;;  %1053 = vmatpush.msrb.mxu1 %v979_v48  ;;  %v962_v30 = vld [vmem:[%s2553_s6 + $0x48] sm:$0xff]  ;;  %v957_v34 = vld [vmem:[%s2553_s6 + $0x20] sm:$0xff] }
 0x1dd   : > { %1069 = vmatpush.msra.mxu0 %v999_v33  ;;  %1096 = vmatpush.msra.mxu2 %v1008_v46  ;;  %v958_v33 = vld [vmem:[%s2553_s6 + $0x28] sm:$0xff]  ;;  %v953_v37 = vld [vmem:[%s2553_s6] sm:$0xff]  ;;  %v1020_v46 = vld [vmem:[%s2553_s6 + $0x218] sm:$0xff] }
 0x1de   : > { %940 = vmatpush.msra.mxu3 %v847_v25  ;;  %1054 = vmatpush.msrb.mxu1 %v978_v52  ;;  %v966_v25 = vld [vmem:[%s2553_s6 + $0x68] sm:$0xff] }
 0x1df   : > { %1070 = vmatpush.msra.mxu0 %v998_v36  ;;  %1097 = vmatpush.msra.mxu2 %v1007_v50  ;;  %v954_v36 = vld [vmem:[%s2553_s6 + $0x8] sm:$0xff] }
 0x1e0   : > { %753 = vrot.lane.b32.xlu0 %v752_v5, %s1566_s21  ;;  %941 = vmatpush.msra.mxu3 %v846_v28  ;;  %v989_v5 = vld [vmem:[%s2553_s6 + $0x120] sm:$0xff]  ;;  %v964_v28 = vld [vmem:[%s2553_s6 + $0x58] sm:$0xff]  ;;  %v1022_v43 = vld [vmem:[%s2553_s6 + $0x228] sm:$0xff] }
 0x1e1   : > { %1071 = vmatpush.msra.mxu0 %v997_v40  ;;  %1098 = vmatpush.msra.mxu2 %v1006_v54  ;;  %v1025_v40 = vld [vmem:[%s2553_s6 + $0x240] sm:$0xff]  ;;  %v1018_v48 = vld [vmem:[%s2553_s6 + $0x208] sm:$0xff] }
 0x1e2   : > { %942 = vmatpush.msra.mxu3 %v845_v31  ;;  %1055 = vmatpush.msrb.mxu1 %v977_v56  ;;  %v960_v31 = vld [vmem:[%s2553_s6 + $0x38] sm:$0xff] }
 0x1e3   : > { %1072 = vmatpush.msra.mxu0 %v996_v45  ;;  %1099 = vmatpush.msra.mxu2 %v1005_v58  ;;  %v1021_v45 = vld [vmem:[%s2553_s6 + $0x220] sm:$0xff] }
 0x1e4   : > { %943 = vmatpush.msra.mxu3 %v844_v10  ;;  %1056 = vmatpush.msrb.mxu1 %v976_v59  ;;  %v956_v10 = vld [vmem:[%s2553_s6 + $0x18] sm:$0xff] }
 0x1e5   : > { %1073 = vmatpush.msra.mxu0 %v995_v49  ;;  %1100 = vmatpush.msra.mxu2 %v1004_v61  ;;  %v1017_v49 = vld [vmem:[%s2553_s6 + $0x200] sm:$0xff] }
 0x1e6   : > { %944 = vmatpush.msra.mxu3 %v843_v38  ;;  %1057 = vmatpush.msrb.mxu1 %v975_v62  ;;  %v1027_v38 = vld [vmem:[%s2553_s6 + $0x250] sm:$0xff] }
 0x1e7   : > { %1074 = vmatpush.msra.mxu0 %v994_v53  ;;  %1101 = vmatpush.msra.mxu2 %v1003_v0 }
 0x1e8   : > { %945 = vmatpush.msra.mxu3 %v842_v42  ;;  %1058 = vmatpush.msrb.mxu1 %v974_v1  ;;  %v1023_v42 = vld [vmem:[%s2553_s6 + $0x230] sm:$0xff] }
 0x1e9   : > { %1075 = vmatpush.msra.mxu0 %v993_v57  ;;  %1102 = vmatpush.msra.mxu2 %v1002_v3 }
 0x1ea   : > { %946 = vmatpush.msra.mxu3 %v841_v47  ;;  %1059 = vmatpush.msrb.mxu1 %v973_v4  ;;  %v1019_v47 = vld [vmem:[%s2553_s6 + $0x210] sm:$0xff] }
 0x1eb   : > { %1076 = vmatpush.msra.mxu0 %v992_v60  ;;  %1103 = vmatpush.msra.mxu2 %v1001_v6  ;;  %v1197_v6 = vld [vmem:[%s2556_s9 + $0x78] sm:$0xff] }
 0x1ec   : > { %947 = vmatpush.msra.mxu3 %v840_v51  ;;  %1060 = vmatpush.msrb.mxu1 %v972_v7  ;;  %v1213_v7 = vld [vmem:[%s2556_s9 + $0xf8] sm:$0xff] }
 0x1ed   : > { %1077 = vmatpush.msra.mxu0 %v991_v63 }
 0x1ee   : > { %948 = vmatpush.msra.mxu3 %v839_v55  ;;  %1061 = vmatpush.msrb.mxu1 %v971_v12  ;;  %v1212_v12 = vld [vmem:[%s2556_s9 + $0xf0] sm:$0xff] }
 0x1ef   : > { %1078 = vmatpush.msra.mxu0 %v990_v2 }
 0x1f0   : > { %1062 = vmatpush.msrb.mxu1 %v970_v14  ;;  %v1211_v14 = vld [vmem:[%s2556_s9 + $0xe8] sm:$0xff] }
 0x1f1   : > { %1079 = vmatpush.msra.mxu0 %v989_v5  ;;  %v1129_v5 = vld [vmem:[%s2554_s7] sm:$0xff] }
 0x1f2   : > { %1063 = vmatpush.msrb.mxu1 %v969_v16  ;;  %v1210_v16 = vld [vmem:[%s2556_s9 + $0xe0] sm:$0xff] }
 0x1f3   : > { %1080 = vmatpush.msra.mxu0 %v988_v11  ;;  %v1196_v11 = vld [vmem:[%s2556_s9 + $0x70] sm:$0xff] }
 0x1f5   : > { %1081 = vmatpush.msra.mxu0 %v987_v13  ;;  %v1195_v13 = vld [vmem:[%s2556_s9 + $0x68] sm:$0xff] }
 0x1f7   : > { %1082 = vmatpush.msra.mxu0 %v986_v15  ;;  %v1194_v15 = vld [vmem:[%s2556_s9 + $0x60] sm:$0xff] }
 0x1f9   : > { %1083 = vmatpush.msra.mxu0 %v985_v17  ;;  %v1193_v17 = vld [vmem:[%s2556_s9 + $0x58] sm:$0xff] }
 0x231   : > { %v760_v18 = vpop.permute.xlu2 %759 }
 0x249   : > { %v2264_v19 = vpop.permute.xlu1 %765 }
 0x24a   : > { %v748_v20 = vpop.permute.xlu0 %747  ;;  %v774_v21 = vsel %vm773_vm10, %v760_v18, %v2264_v19 }
 0x24b   : > { %v769_v23 = vsel %vm768_vm11, %v1998_v44, %v748_v20  ;;  %929 = vmatmul.f32.vlgmr.msrb.gmra.mxu2 %v774_v21 }
 0x24c   : > { %869 = vmatmul.f32.vlgmr.msrb.gmra.mxu3 %v769_v23  ;;  %1246 = vmatpush.msrb.mxu2 %v1213_v7 }
 0x24d   : > { %1028 = vmatpush.msrb.mxu3 %v968_v22  ;;  %v1495_v22 = vld [vmem:[%s2555_s8] ss:$0 sm:$0xff] }
 0x24e   : > { %1247 = vmatpush.msrb.mxu2 %v1212_v12 }
 0x24f   : > { %1029 = vmatpush.msrb.mxu3 %v967_v24 }
 0x250   : > { %1248 = vmatpush.msrb.mxu2 %v1211_v14 }
 0x251   : > { %1030 = vmatpush.msrb.mxu3 %v966_v25 }
 0x252   : > { %v754_v27 = vpop.permute.xlu0 %753  ;;  %1249 = vmatpush.msrb.mxu2 %v1210_v16 }
 0x253   : > { %1031 = vmatpush.msrb.mxu3 %v965_v26  ;;  %v770_v44 = vsel %vm526_vm8, %v748_v20, %v754_v27  ;;  %v772_v8 = vsel %vm771_vm12, %v754_v27, %v760_v18  ;;  %1104 = vmatmul.f32.vlgmr.msra.gmra.mxu2 %v774_v21  ;;  %v1209_v18 = vld [vmem:[%s2556_s9 + $0xd8] sm:$0xff] }
 0x254   : > { %889 = vmatmul.f32.vlgmr.msra.gmra.mxu1 %v770_v44  ;;  %909 = vmatmul.f32.vlgmr.msrb.gmra.mxu0 %v772_v8 }
 0x255   : > { %1422 = vmatmul.msk.f32.vlgmr.msra.gmra.mxu3 %vm850_vm13, %v2264_v19  ;;  %1226 = vmatpush.msrb.mxu0 %v1197_v6 }
 0x256   : > { %1032 = vmatpush.msrb.mxu3 %v964_v28  ;;  %1250 = vmatpush.msrb.mxu2 %v1209_v18  ;;  %v1191_v28 = vld [vmem:[%s2556_s9 + $0x48] sm:$0xff] }
 0x257   : > { %1227 = vmatpush.msrb.mxu0 %v1196_v11 }
 0x258   : > { %1033 = vmatpush.msrb.mxu3 %v963_v29  ;;  %v1207_v29 = vld [vmem:[%s2556_s9 + $0xc8] sm:$0xff] }
 0x259   : > { %1228 = vmatpush.msrb.mxu0 %v1195_v13 }
 0x25a   : > { %1034 = vmatpush.msrb.mxu3 %v962_v30  ;;  %v1190_v30 = vld [vmem:[%s2556_s9 + $0x40] sm:$0xff] }
 0x25b   : > { %1229 = vmatpush.msrb.mxu0 %v1194_v15  ;;  %v1294_v15 = vld [vmem:[%s2559_s12] sm:$0x1] }
 0x25c   : > { %1035 = vmatpush.msrb.mxu3 %v961_v9  ;;  %1064 = vmatmul.f32.vlgmr.msrb.gmra.mxu1 %v770_v44  ;;  %v1206_v9 = vld [vmem:[%s2556_s9 + $0xc0] sm:$0xff] }
 0x25d   : > { %1084 = vmatmul.f32.vlgmr.msra.gmra.mxu0 %v772_v8  ;;  %v1208_v8 = vld [vmem:[%s2556_s9 + $0xd0] sm:$0xff] }
 0x25e   : > { %1036 = vmatpush.msrb.mxu3 %v960_v31  ;;  %1230 = vmatpush.msrb.mxu0 %v1193_v17  ;;  %v1189_v31 = vld [vmem:[%s2556_s9 + $0x38] sm:$0xff] }
 0x25f   : > { %1251 = vmatpush.msrb.mxu2 %v1208_v8 }
 0x260   : > { %1037 = vmatpush.msrb.mxu3 %v959_v32  ;;  %v1221_v32 = vld [vmem:[%s2556_s9 + $0x138] sm:$0xff] }
 0x261   : > { %1252 = vmatpush.msrb.mxu2 %v1207_v29 }
 0x262   : > { %1038 = vmatpush.msrb.mxu3 %v958_v33  ;;  %v1205_v33 = vld [vmem:[%s2556_s9 + $0xb8] sm:$0xff] }
 0x263   : > { %1253 = vmatpush.msrb.mxu2 %v1206_v9 }
 0x264   : > { %1039 = vmatpush.msrb.mxu3 %v957_v34  ;;  %v1188_v34 = vld [vmem:[%s2556_s9 + $0x30] sm:$0xff] }
 0x265   : > { %1254 = vmatpush.msrb.mxu2 %v1205_v33 }
 0x266   : > { %1040 = vmatpush.msrb.mxu3 %v956_v10  ;;  %v1220_v10 = vld [vmem:[%s2556_s9 + $0x130] sm:$0xff] }
 0x268   : > { %1041 = vmatpush.msrb.mxu3 %v955_v35  ;;  %v1219_v35 = vld [vmem:[%s2556_s9 + $0x128] sm:$0xff] }
 0x26a   : > { %1042 = vmatpush.msrb.mxu3 %v954_v36  ;;  %v1204_v36 = vld [vmem:[%s2556_s9 + $0xb0] sm:$0xff] }
 0x26b   : > { %1255 = vmatpush.msrb.mxu2 %v1204_v36 }
 0x26c   : > { %1043 = vmatpush.msrb.mxu3 %v953_v37  ;;  %v1187_v37 = vld [vmem:[%s2556_s9 + $0x28] sm:$0xff] }
 0x26d   : > { %1044 = vmatmul.f32.vlgmr.msrb.gmra.mxu3 %v769_v23 }
 0x26e   : > { %1113 = vmatpush.msra.mxu3 %v1027_v38  ;;  %v1218_v38 = vld [vmem:[%s2556_s9 + $0x120] sm:$0xff] }
 0x270   : > { %1114 = vmatpush.msra.mxu3 %v1026_v39  ;;  %v1203_v39 = vld [vmem:[%s2556_s9 + $0xa8] sm:$0xff] }
 0x271   : > { %1256 = vmatpush.msrb.mxu2 %v1203_v39 }
 0x272   : > { %1115 = vmatpush.msra.mxu3 %v1025_v40  ;;  %v1186_v40 = vld [vmem:[%s2556_s9 + $0x20] sm:$0xff] }
 0x274   : > { %1116 = vmatpush.msra.mxu3 %v1024_v41  ;;  %v1217_v41 = vld [vmem:[%s2556_s9 + $0x118] sm:$0xff] }
 0x276   : > { %1117 = vmatpush.msra.mxu3 %v1023_v42  ;;  %v1202_v42 = vld [vmem:[%s2556_s9 + $0xa0] sm:$0xff] }
 0x277   : > { %1257 = vmatpush.msrb.mxu2 %v1202_v42 }
 0x278   : > { %1118 = vmatpush.msra.mxu3 %v1022_v43  ;;  %v1185_v43 = vld [vmem:[%s2556_s9 + $0x18] sm:$0xff] }
 0x27a   : > { %1119 = vmatpush.msra.mxu3 %v1021_v45  ;;  %v1201_v45 = vld [vmem:[%s2556_s9 + $0x98] sm:$0xff] }
 0x27b   : > { %1258 = vmatpush.msrb.mxu2 %v1201_v45 }
 0x27c   : > { %1120 = vmatpush.msra.mxu3 %v1020_v46  ;;  %v1184_v46 = vld [vmem:[%s2556_s9 + $0x10] sm:$0xff] }
 0x27e   : > { %1121 = vmatpush.msra.mxu3 %v1019_v47  ;;  %v1200_v47 = vld [vmem:[%s2556_s9 + $0x90] sm:$0xff] }
 0x27f   : > { %1259 = vmatpush.msrb.mxu2 %v1200_v47 }
 0x280   : > { %1122 = vmatpush.msra.mxu3 %v1018_v48  ;;  %v1183_v48 = vld [vmem:[%s2556_s9 + $0x8] sm:$0xff] }
 0x282   : > { %1123 = vmatpush.msra.mxu3 %v1017_v49  ;;  %v1199_v49 = vld [vmem:[%s2556_s9 + $0x88] sm:$0xff] }
 0x283   : > { %1423 = vmatmul.msk.f32.vlgmr.msra.gmra.mxu3 %vm850_vm13, %v2264_v19  ;;  %v1192_v19 = vld [vmem:[%s2556_s9 + $0x50] sm:$0xff]  ;;  %1260 = vmatpush.msrb.mxu2 %v1199_v49 }
 0x284   : > { %1231 = vmatpush.msrb.mxu0 %v1192_v19 }
 0x286   : > { %1232 = vmatpush.msrb.mxu0 %v1191_v28 }
 0x288   : > { %1233 = vmatpush.msrb.mxu0 %v1190_v30 }
 0x28a   : > { %1234 = vmatpush.msrb.mxu0 %v1189_v31 }
 0x28c   : > { %1235 = vmatpush.msrb.mxu0 %v1188_v34 }
 0x28e   : > { %1236 = vmatpush.msrb.mxu0 %v1187_v37 }
 0x290   : > { %1237 = vmatpush.msrb.mxu0 %v1186_v40 }
 0x292   : > { %1238 = vmatpush.msrb.mxu0 %v1185_v43 }
 0x294   : > { %1239 = vmatpush.msrb.mxu0 %v1184_v46 }
 0x296   : > { %1240 = vmatpush.msrb.mxu0 %v1183_v48 }
 0x2ce   : > { %v930_v54 = vpop.f32.mrf.mxu2 }
 0x2cf   : > { %v870_v50 = vpop.f32.mrf.mxu3 }
 0x2d1   : > { %v890_v51 = vpop.f32.mrf.mxu1  ;;  %v910_v53 = vpop.f32.mrf.mxu0 }
 0x2d2   : > { %v891_v56 = vadd.f32 %v890_v51, %v870_v50  ;;  %v1216_v50 = vld [vmem:[%s2556_s9 + $0x110] sm:$0xff]  ;;  %v1215_v51 = vld [vmem:[%s2556_s9 + $0x108] sm:$0xff] }
 0x2d4   : > { %v911_v59 = vadd.f32 %v910_v53, %v891_v56  ;;  %v1182_v53 = vld [vmem:[%s2556_s9] sm:$0xff] }
 0x2d5   : > { %1241 = vmatpush.msrb.mxu0 %v1182_v53 }
 0x2d6   : > { %v931_v62 = vadd.f32 %v930_v54, %v911_v59  ;;  %v1105_v63 = vpop.f32.mrf.mxu2  ;;  %v1198_v54 = vld [vmem:[%s2556_s9 + $0x80] sm:$0xff] }
 0x2d7   : > { %1261 = vmatpush.msrb.mxu2 %v1198_v54 }
 0x2d8   : > { %v950_v52 = vpop.f32.mrf.mxu3 }
 0x2d9   : > { %v1065_v57 = vpop.f32.mrf.mxu1  ;;  %v951_v2 = vadd.f32 %v950_v52, %v931_v62  ;;  %v1214_v52 = vld [vmem:[%s2556_s9 + $0x100] sm:$0xff]  ;;  %v1292_v62 = vld [vmem:[%s2558_s11 + $0x28] sm:$0xff] }
 0x2da   : > { %v1085_v60 = vpop.f32.mrf.mxu0 }
 0x2f0   : > { %v1045_v55 = vpop.f32.mrf.mxu3 }
 0x2f1   : > { %v1066_v58 = vadd.f32 %v1065_v57, %v1045_v55 }
 0x2f3   : > { %v1086_v61 = vadd.f32 %v1085_v60, %v1066_v58 }
 0x2f5   : > { %v1106_v0 = vadd.f32 %v1105_v63, %v1086_v61  ;;  %v1293_v61 = vld [vmem:[%s2558_s11 + $0x30] sm:$0x3]  ;;  %v1291_v63 = vld [vmem:[%s2558_s11 + $0x20] sm:$0xff] }
 0x2f6   : > { %1426 = vmatpush.msk.msrb.mxu3 %vm1299_vm2, %v1293_v61 }
 0x2f8   : > { %1313 = vmatpush.msrb.mxu3 %v1292_v62 }
 0x2fa   : > { %1314 = vmatpush.msrb.mxu3 %v1291_v63 }
 0x306   : > { %v1125_v1 = vpop.f32.mrf.mxu3 }
 0x307   : > { %v1126_v3 = vadd.f32 %v1125_v1, %v1106_v0  ;;  %v1290_v0 = vld [vmem:[%s2558_s11 + $0x18] sm:$0xff]  ;;  %v1289_v1 = vld [vmem:[%s2558_s11 + $0x10] sm:$0xff] }
 0x308   : > { %1315 = vmatpush.msrb.mxu3 %v1290_v0 }
 0x309   : > { %v1128_v4 = vmax.f32 %v951_v2, %v1126_v3  ;;  %v1288_v2 = vld [vmem:[%s2558_s11 + $0x8] sm:$0xff]  ;;  %v1287_v3 = vld [vmem:[%s2558_s11] sm:$0xff] }
 0x30a   : > { %1316 = vmatpush.msrb.mxu3 %v1289_v1 }
 0x30b   : > { %1149 = vmatpush.msra.mxu1 %v1128_v4  ;;  %v1222_v4 = vld [vmem:[%s2557_s10] sm:$0x1] }
 0x30c   : > { %1424 = vmatmul.msk.f32.vlgmr.msra.gmra.mxu1 %vm1130_vm14, %v1129_v5  ;;  %1317 = vmatpush.msrb.mxu3 %v1288_v2 }
 0x30d   : > { %1274 = vmatpush.msrb.mxu1 %v1221_v32 }
 0x30e   : > { %1318 = vmatpush.msrb.mxu3 %v1287_v3 }
 0x30f   : > { %1275 = vmatpush.msrb.mxu1 %v1220_v10 }
 0x311   : > { %1276 = vmatpush.msrb.mxu1 %v1219_v35 }
 0x313   : > { %1277 = vmatpush.msrb.mxu1 %v1218_v38 }
 0x315   : > { %1278 = vmatpush.msrb.mxu1 %v1217_v41 }
 0x317   : > { %1279 = vmatpush.msrb.mxu1 %v1216_v50 }
 0x319   : > { %1280 = vmatpush.msrb.mxu1 %v1215_v51 }
 0x31b   : > { %1281 = vmatpush.msrb.mxu1 %v1214_v52 }
 0x389   : > { %v1151_v20 = vpop.f32.mrf.mxu1 }
 0x38a   : > { %v1155_v21 = vrot.slane %v1151_v20, 4 }
 0x38c   : > { %v1157_v23 = vmax.f32 %v1151_v20, %v1155_v21 }
 0x38e   : > { %v1162_v24 = vadd.f32 %v1495_v22, %v1157_v23 }
 0x390   : > { %v2393_v25 = vmax.f32 %v1162_v24, 0.0 }
 0x392   : > { %v1165_v26 = vrot.slane %v2393_v25, 1  ;;  %v1173_v27 = vrot.slane %v2393_v25, 3  ;;  %v1169_v44 = vrot.slane %v2393_v25, 2 }
 0x394   : > { %1166 = vrot.lane.b32.xlu1 %v1165_v26, %s1571_s19  ;;  %1174 = vrot.lane.b32.xlu0 %v1173_v27, %s1566_s21  ;;  %s431_s19 = sand.u32 1, %s1554_s26  }
 0x395   : > { %1170 = vrot.lane.b32.xlu2 %v1169_v44, %s1572_s15  ;;  %s432_s20 = scalar_lea.vmem [#allocation2], %s431_s19  ;;  %s1338_s23 = scalar_lea.sflag [#allocation3], %s431_s19 }
 0x396   : > { %s1348_s27 = sshll.u32 %s432_s20, 4  ;;  %s1349_s27 = int_to_ptr.vmem [resolvable:$true] %s1348_s27 }
 0x3ef   : > { %v1171_v55 = vpop.permute.xlu2 %1170 }
 0x406   : > { %v1167_v56 = vpop.permute.xlu1 %1166  ;;  %v1175_v57 = vpop.permute.xlu0 %1174 }
 0x407   : > { %v1178_v58 = vsel %vm1177_vm15, %v2393_v25, %v1167_v56  ;;  %v1180_v59 = vsel %vm1179_vm0, %v1167_v56, %v1171_v55  ;;  %1425 = vmatmul.msk.f32.vlgmr.msrb.gmra.mxu1 %vm1223_vm1, %v1175_v57 }
 0x408   : > { %v1181_v60 = vsel %vm526_vm8, %v1180_v59, %v1175_v57  ;;  %1242 = vmatmul.f32.vlgmr.msrb.gmra.mxu0 %v1178_v58 }
 0x409   : > { %1262 = vmatmul.f32.vlgmr.msrb.gmra.mxu2 %v1181_v60 }
 0x484   : > { %v1283_v12 = vpop.f32.mrf.mxu1 }
 0x485   : > { %v1243_v5 = vpop.f32.mrf.mxu0 }
 0x486   : > { %v1244_v6 = vadd.f32 %v1243_v5, %v1222_v4 }
 0x48c   : > { %v1263_v7 = vpop.f32.mrf.mxu2 }
 0x48d   : > { %v1264_v11 = vadd.f32 %v1263_v7, %v1244_v6 }
 0x48f   : > { %v1284_v13 = vadd.f32 %v1283_v12, %v1264_v11 }
 0x491   : > { %v1286_v14 = vmax.f32 %v1284_v13, 0.0 }
 0x493   : > { %1427 = vmatmul.msk.f32.vlgmr.msrb.gmra.mxu3 %vm1295_vm3, %v1286_v14 }
 0x516   : > { %v1320_v16 = vpop.f32.mrf.mxu3 }
 0x517   : > { %v1321_v17 = vadd.f32 %v1320_v16, %v1294_v15 }
 0x519   : > { %v1324_v18 = vsel %vm1323_vm4, %v1321_v17, -inf }
 0x51a   : > { %1325 = vmax.xlane.f32.xlu1 %v1324_v18 }
 0x58d   : > { %v1326_v19 = vpop.xlane.xlu1 %1325 }
 0x58e   : > { %v1327_v20 = vsub.f32 %v1321_v17, %v1326_v19 }
 0x590   : > { %v1328_v21 = vmul.f32 1.442695, %v1327_v20 }
 0x592   : > { %1496 = vpow2.f32 %v1328_v21 }
 0x598   : > { %v1497_v22 = vpop.eup %1496 }
 0x599   : > { %v1330_v23 = vsel %vm1323_vm4, %v1497_v22, 0.0 }
 0x59a   : > { %1331 = vadd.xlane.f32.xlu2 %v1330_v23 }
 0x60d   : > { %v1332_v24 = vpop.xlane.xlu2 %1331 }
 0x60e   : > { %1498 = vlog2.f32 %v1332_v24 }
 0x614   : > { %v1499_v25 = vpop.eup %1498 }
 0x615   : > { %v1334_v26 = vmul.f32 0.6931472, %v1499_v25 }
 0x617   : > { %v1335_v27 = vsub.f32 %v1327_v20, %v1334_v26 }
 0x619   : > { %1336 = vst [vmem:[%s432_s20] sm:$0x1] %v1335_v27 }
 0x61a   : > { %1527 = shalt.err (!%p1524_p3)
}
 0x61b   : > { %1431 = dma.vmem_to_hbm [thread:$0]  (%p1681_p5), %s1349_s27, 16, %s1351_s22, %s1338_s23  }
 0x61c PF: > { %s2573_s19 = sld [smem:[#allocation5_spill]]  ;;  %p1437_p4 = scmp.ge.s32.totalorder %s1562_s28, 2 }
 0x61e   : > { %p1434_p7 = pnand %p1437_p4, %p1685_p6 }
 0x620   : > { %p1435_p8 = pneg %p1434_p7 }
 0x622   : > { %s1362_s17 = sand.u32 1, %s2573_s19  }
 0x623   : > { %s1363_s20 = scalar_lea.sflag [#allocation3], %s1362_s17 }
 0x624   : > { %1545 = dma.done.wait (%p1435_p8), %s1363_s20, 16  }
 0x625   : > { %1547 = vsyncadd (%p1435_p8), %s1363_s20, 4294967280  ;;  %s2575_s28 = sld [smem:[#allocation7_spill]]  ;;  %s2578_s25 = smov %s1554_s26 }
 0x626   : > { %s2576_s24 = sld [smem:[#allocation6_spill]] }
 0x627   : > { %s2577_s27 = sld [smem:[#allocation8_spill]] }
 0x62b   : > { %p23_p9 = scmp.ge.s32.totalorder %s2575_s28, 4  }
 0x62c   : > { %s2579_s26 = smov %s2576_s24 }
 0x62d   :  { %25 = sbr.rel (!%p23_p9) target bundleno = 3 (0x3), region = 107 }
 0x632   :  { %1368 = vsyncpa [#allocation3], 1 }
 0x633   :  { %1370 = vsyncpa [#allocation3 + $0x1], 1 }

</bundles_post_ra>
